<compile_context>
chip_gen: v6e
topology: v6e:2x2x1
jax: 0.10.0
libtpu: 0.0.40
codegen_flags: <defaults>
</compile_context>

<pallas_src>
import functools

import jax
import jax.numpy as jnp
from jax.experimental import pallas as pl
from jax.experimental.pallas import tpu as pltpu

D_MODEL = 64
HIDDEN = 128
NUM_HEADS = 4
HEAD_DIM = D_MODEL // NUM_HEADS
EPS = 1e-5

_VMEM_BUDGET = 24 * 1024 * 1024   # per-step intermediate budget (fits the
                                  # 32 MiB scoped default on every chip gen)


def _layer_norm(h, gamma, beta):
    mu = jnp.mean(h, axis=-1, keepdims=True)
    var = jnp.mean(jnp.square(h - mu), axis=-1, keepdims=True)
    return (h - mu) * jax.lax.rsqrt(var + EPS) * gamma + beta


def encoder_layer_kernel(
    x_ref,                      # (R, D) f32     block of BB whole sequences
    wqkv_ref, bqkv_ref,         # (D, 3D) bf16, (1, 3D) f32   fused in-proj
    wo_ref, bo_ref,             # (H, hd, D) bf16, (1, D) f32 head-major Wo
    g1_ref, be1_ref,            # (1, D), (1, D) f32          norm1
    w1_ref, b1_ref,             # (D, H) bf16, (1, H) f32
    w2_ref, b2_ref,             # (H, D) bf16, (1, D) f32
    g2_ref, be2_ref,            # (1, D), (1, D) f32          norm2
    o_ref,                      # (R, D) f32
    *, bb, seq,
):
    rows = bb * seq
    x = x_ref[...]                                    # f32; residual path stays f32

    # ---- fused QKV projection: bf16 operands, f32 accumulate ----
    # (1/sqrt(head_dim) is pre-folded into the q columns of wqkv/bqkv.)
    qkv = jnp.dot(x.astype(jnp.bfloat16), wqkv_ref[...],
                  preferred_element_type=jnp.float32) + bqkv_ref[...]
    qkv = qkv.reshape(bb, seq, 3 * D_MODEL)
    qkv_b = qkv.astype(jnp.bfloat16)                  # MXU-operand copy

    # ---- multi-head self-attention with Wo folded into the PV matmul ----
    #   attn = bo + sum_h softmax(Q_h K_h^T) @ (V_h @ Wo_h)
    attn = jnp.broadcast_to(bo_ref[...].reshape(1, 1, D_MODEL),
                            (bb, seq, D_MODEL))       # f32 accumulator init
    for h in range(NUM_HEADS):                        # static, 4 iterations
        lo = h * HEAD_DIM
        qh = qkv_b[:, :, lo:lo + HEAD_DIM]                                 # (BB,S,hd)
        kh = qkv_b[:, :, D_MODEL + lo:D_MODEL + lo + HEAD_DIM]
        vh = qkv_b[:, :, 2 * D_MODEL + lo:2 * D_MODEL + lo + HEAD_DIM]
        # softmax statistics in f32 (v5e-safe: no bf16 VPU/EUP work)
        s = jnp.einsum('bqd,bkd->bqk', qh, kh,
                       preferred_element_type=jnp.float32)                 # (BB,S,S)
        s = s - jnp.max(s, axis=-1, keepdims=True)
        p = jnp.exp(s)
        p = p * pl.reciprocal(jnp.sum(p, axis=-1, keepdims=True), approx=True)
        # V_h @ Wo_h : K = head_dim, N = D  (lane-dense, no 16-lane concat)
        vw = jnp.einsum('bkd,de->bke', vh, wo_ref[h],
                        preferred_element_type=jnp.float32)                # (BB,S,D)
        attn = attn + jnp.einsum('bqk,bke->bqe',
                                 p.astype(jnp.bfloat16),
                                 vw.astype(jnp.bfloat16),
                                 preferred_element_type=jnp.float32)
    attn = attn.reshape(rows, D_MODEL)

    # ---- residual + LayerNorm 1 (f32 VPU math) ----
    x1 = _layer_norm(x + attn, g1_ref[...], be1_ref[...])

    # ---- MLP: Linear -> ReLU -> Linear (bf16 operands, f32 accumulate) ----
    h1 = jnp.dot(x1.astype(jnp.bfloat16), w1_ref[...],
                 preferred_element_type=jnp.float32) + b1_ref[...]
    h1 = jnp.maximum(h1, 0.0)
    mlp = jnp.dot(h1.astype(jnp.bfloat16), w2_ref[...],
                  preferred_element_type=jnp.float32) + b2_ref[...]

    # ---- residual + LayerNorm 2 ----
    x2 = _layer_norm(x1 + mlp, g2_ref[...], be2_ref[...])
    o_ref[...] = x2.astype(o_ref.dtype)


def _block_vmem_bytes(bb, seq):
    """Rough per-step VMEM footprint of the main intermediates (bytes)."""
    r = bb * seq
    io = 2 * 2 * r * D_MODEL * 4              # double-buffered x / o blocks
    qkv = r * 3 * D_MODEL * (4 + 2)           # f32 qkv + bf16 operand copy
    scores = 2 * bb * seq * seq * 4           # s and p live together (f32)
    mlp = r * HIDDEN * (4 + 2)                # h1 f32 + bf16 copy
    acc = 2 * r * D_MODEL * 4                 # attn accumulator + x1
    return io + qkv + scores + mlp + acc


def _pick_batch_block(B, S, *, target_rows=2048, min_blocks=8):
    """Whole batches per grid step.

    Tiny problems run as a single step (per-step overhead ~600 cyc would
    dominate).  Large problems use blocks up to ~target_rows rows while
    keeping >= min_blocks steps (so both v7x TensorCores get several
    double-buffered steps).  Block rows must be a multiple of 8 (sublane
    rule) and fit the VMEM budget.
    """
    # TODO(synk): very long sequences (S^2 scores > VMEM) need flash-style
    # sequence tiling; this kernel keeps the full (S,S) score block resident.
    if B == 1 or (B * S <= 1024 and _block_vmem_bytes(B, S) <= _VMEM_BUDGET):
        return B                                # single full-array block
    divisors = [d for d in range(1, B) if B % d == 0]
    valid = [d for d in divisors
             if (d * S) % 8 == 0 and _block_vmem_bytes(d, S) <= _VMEM_BUDGET]
    if not valid:
        return B                                # full-array block fallback
    preferred = [d for d in valid if d * S <= target_rows and B // d >= min_blocks]
    if preferred:
        return max(preferred)
    fits = [d for d in valid if d * S <= target_rows]
    return max(fits) if fits else min(valid)


def _vmem_limit_bytes():
    """Scoped-VMEM limit sized from the actual chip (v7x: 64 MiB physical)."""
    try:
        cap = pltpu.get_tpu_info().vmem_capacity_bytes
        return int(min(cap // 2, 64 * 1024 * 1024))
    except Exception:
        return None                             # keep the compiler default


def _cost_estimate(B, S, prepared):
    D, H = D_MODEL, HIDDEN
    tokens = B * S
    flops = tokens * (2 * D * 3 * D                     # qkv projection
                      + NUM_HEADS * 2 * S * HEAD_DIM    # Q K^T (all heads)
                      + NUM_HEADS * 2 * HEAD_DIM * D    # V_h @ Wo_h
                      + NUM_HEADS * 2 * S * D           # P @ (V Wo)
                      + 4 * D * H)                      # MLP
    transcendentals = B * NUM_HEADS * S * S + 2 * tokens
    param_bytes = sum(int(v.size) * v.dtype.itemsize for v in prepared.values())
    bytes_accessed = 2 * tokens * D * 4 + param_bytes
    return pl.CostEstimate(flops=int(flops),
                           transcendentals=int(transcendentals),
                           bytes_accessed=int(bytes_accessed))


def prepare_params(p):
    """One-time parameter prep: fuse q/k/v, fold the attention scale, cast
    matmul weights to bf16, store Wo head-major."""
    scale = 1.0 / (HEAD_DIM ** 0.5)
    wqkv = jnp.concatenate([p["wq"] * scale, p["wk"], p["wv"]], axis=1)
    bqkv = jnp.concatenate([p["bq"] * scale, p["bk"], p["bv"]], axis=1)
    return {
        "wqkv": wqkv.astype(jnp.bfloat16),
        "bqkv": bqkv,                                      # biases stay f32
        "wo": p["wo"].reshape(NUM_HEADS, HEAD_DIM, D_MODEL).astype(jnp.bfloat16),
        "bo": p["bo"],
        "g1": p["g1"], "be1": p["be1"],
        "w1": p["w1"].astype(jnp.bfloat16), "b1": p["b1"],
        "w2": p["w2"].astype(jnp.bfloat16), "b2": p["b2"],
        "g2": p["g2"], "be2": p["be2"],
    }


def transformer_encoder_layer(x, prepared):
    """x: [B, S, D] float32.  prepared: output of prepare_params()."""
    B, S, D = x.shape
    assert D == D_MODEL
    H = HIDDEN

    BB = _pick_batch_block(B, S)
    n_blocks = B // BB
    R = BB * S                                   # rows per grid step

    x_flat = x.reshape(B * S, D)                 # free wrapper-side reshape

    full = lambda shape: pl.BlockSpec(shape, lambda i, _n=len(shape): (0,) * _n)
    in_specs = [
        pl.BlockSpec((R, D), lambda i: (i, 0)),           # x rows
        full((D, 3 * D)), full((1, 3 * D)),               # wqkv, bqkv
        full((NUM_HEADS, HEAD_DIM, D)), full((1, D)),     # wo (head-major), bo
        full((1, D)), full((1, D)),                       # norm1 gamma/beta
        full((D, H)), full((1, H)),                       # w1, b1
        full((H, D)), full((1, D)),                       # w2, b2
        full((1, D)), full((1, D)),                       # norm2 gamma/beta
    ]

    grid_spec = pltpu.PrefetchScalarGridSpec(
        num_scalar_prefetch=0,
        grid=(n_blocks,),
        in_specs=in_specs,
        out_specs=pl.BlockSpec((R, D), lambda i: (i, 0)),
    )

    kernel = functools.partial(encoder_layer_kernel, bb=BB, seq=S)

    out_flat = pl.pallas_call(
        kernel,
        out_shape=jax.ShapeDtypeStruct((B * S, D), jnp.float32),
        grid_spec=grid_spec,
        compiler_params=pltpu.CompilerParams(
            dimension_semantics=("parallel",),
            vmem_limit_bytes=_vmem_limit_bytes()),
        cost_estimate=_cost_estimate(B, S, prepared),
    )(
        x_flat,
        prepared["wqkv"], prepared["bqkv"],
        prepared["wo"], prepared["bo"],
        prepared["g1"], prepared["be1"],
        prepared["w1"], prepared["b1"],
        prepared["w2"], prepared["b2"],
        prepared["g2"], prepared["be2"],
    )
    return out_flat.reshape(B, S, D)


def init_params(key):
    """Deterministic synthetic parameters (shapes match the PyTorch module),
    stored pre-transposed as [in_features, out_features]."""
    ks = jax.random.split(key, 16)
    D, H = D_MODEL, HIDDEN
    n = lambda k, shape, s=0.05: jax.random.normal(k, shape, jnp.float32) * s
    return {
        "wq": n(ks[0], (D, D)), "wk": n(ks[1], (D, D)), "wv": n(ks[2], (D, D)),
        "bq": n(ks[3], (1, D)), "bk": n(ks[4], (1, D)), "bv": n(ks[5], (1, D)),
        "wo": n(ks[6], (D, D)), "bo": n(ks[7], (1, D)),
        "g1": jnp.ones((1, D), jnp.float32) + n(ks[8], (1, D), 0.01),
        "be1": n(ks[9], (1, D), 0.01),
        "w1": n(ks[10], (D, H)), "b1": n(ks[11], (1, H)),
        "w2": n(ks[12], (H, D)), "b2": n(ks[13], (1, D)),
        "g2": jnp.ones((1, D), jnp.float32) + n(ks[14], (1, D), 0.01),
        "be2": n(ks[15], (1, D), 0.01),
    }


def reference(x, p):
    """Pure-JAX f32 reference matching torch.nn.MultiheadAttention semantics."""
    B, S, D = x.shape

    def ln(h, g, b):
        mu = jnp.mean(h, -1, keepdims=True)
        var = jnp.mean((h - mu) ** 2, -1, keepdims=True)
        return (h - mu) / jnp.sqrt(var + EPS) * g + b

    q = x @ p["wq"] + p["bq"]
    k = x @ p["wk"] + p["bk"]
    v = x @ p["wv"] + p["bv"]
    qh = q.reshape(B, S, NUM_HEADS, HEAD_DIM)
    kh = k.reshape(B, S, NUM_HEADS, HEAD_DIM)
    vh = v.reshape(B, S, NUM_HEADS, HEAD_DIM)
    s = jnp.einsum("bqhd,bkhd->bhqk", qh, kh) / (HEAD_DIM ** 0.5)
    pmat = jax.nn.softmax(s, axis=-1)
    oh = jnp.einsum("bhqk,bkhd->bqhd", pmat, vh).reshape(B, S, D)
    attn = oh @ p["wo"] + p["bo"]
    x1 = ln(x + attn, p["g1"], p["be1"])
    mlp = jnp.maximum(x1 @ p["w1"] + p["b1"], 0.0) @ p["w2"] + p["b2"]
    return ln(x1 + mlp, p["g2"], p["be2"])


if __name__ == "__main__":
    key = jax.random.PRNGKey(0)
    kx, kp = jax.random.split(key)

    B, S = 2, 8
    x = jax.random.normal(kx, (B, S, D_MODEL), jnp.float32)
    params = init_params(kp)
    prepared = prepare_params(params)          # one-time fuse / fold / bf16 cast

    out = transformer_encoder_layer(x, prepared)
    out = jax.block_until_ready(out)

    ref = reference(x, params)
    assert out.shape == (B, S, D_MODEL)
    # Tolerance covers bf16 MXU operands (f32 accumulation) and the EUP
    # approximate reciprocal in the softmax; semantics otherwise exact.
    err = float(jnp.max(jnp.abs(out - ref)))
    assert err < 2e-2, f"max abs error {err}"

    print("KERNEL_OK")
</pallas_src>

<mosaic_0001>
module attributes {stable_mosaic.version = 11 : i64} {
  func.func @encoder_layer_kernel(%arg0: i32, %arg1: memref<16x64xf32, #tpu.memory_space<vmem>>, %arg2: memref<64x192xbf16, #tpu.memory_space<vmem>>, %arg3: memref<1x192xf32, #tpu.memory_space<vmem>>, %arg4: memref<4x16x64xbf16, #tpu.memory_space<vmem>>, %arg5: memref<1x64xf32, #tpu.memory_space<vmem>>, %arg6: memref<1x64xf32, #tpu.memory_space<vmem>>, %arg7: memref<1x64xf32, #tpu.memory_space<vmem>>, %arg8: memref<64x128xbf16, #tpu.memory_space<vmem>>, %arg9: memref<1x128xf32, #tpu.memory_space<vmem>>, %arg10: memref<128x64xbf16, #tpu.memory_space<vmem>>, %arg11: memref<1x64xf32, #tpu.memory_space<vmem>>, %arg12: memref<1x64xf32, #tpu.memory_space<vmem>>, %arg13: memref<1x64xf32, #tpu.memory_space<vmem>>, %arg14: memref<16x64xf32, #tpu.memory_space<vmem>>) attributes {dimension_semantics = [#tpu.dimension_semantics<parallel>], iteration_bounds = array<i64: 1>, scalar_prefetch = 0 : i64, scratch_operands = 0 : i64, tpu.core_type = #tpu.core_type<tc>, window_params = [{transform_indices = @transform_0, window_bounds = array<i64: 16, 64>}, {pipeline_mode = #tpu.pipeline_mode<synchronous>, transform_indices = @transform_1, window_bounds = array<i64: 64, 192>}, {pipeline_mode = #tpu.pipeline_mode<synchronous>, transform_indices = @transform_2, window_bounds = array<i64: 1, 192>}, {pipeline_mode = #tpu.pipeline_mode<synchronous>, transform_indices = @transform_3, window_bounds = array<i64: 4, 16, 64>}, {pipeline_mode = #tpu.pipeline_mode<synchronous>, transform_indices = @transform_4, window_bounds = array<i64: 1, 64>}, {pipeline_mode = #tpu.pipeline_mode<synchronous>, transform_indices = @transform_5, window_bounds = array<i64: 1, 64>}, {pipeline_mode = #tpu.pipeline_mode<synchronous>, transform_indices = @transform_6, window_bounds = array<i64: 1, 64>}, {pipeline_mode = #tpu.pipeline_mode<synchronous>, transform_indices = @transform_7, window_bounds = array<i64: 64, 128>}, {pipeline_mode = #tpu.pipeline_mode<synchronous>, transform_indices = @transform_8, window_bounds = array<i64: 1, 128>}, {pipeline_mode = #tpu.pipeline_mode<synchronous>, transform_indices = @transform_9, window_bounds = array<i64: 128, 64>}, {pipeline_mode = #tpu.pipeline_mode<synchronous>, transform_indices = @transform_10, window_bounds = array<i64: 1, 64>}, {pipeline_mode = #tpu.pipeline_mode<synchronous>, transform_indices = @transform_11, window_bounds = array<i64: 1, 64>}, {pipeline_mode = #tpu.pipeline_mode<synchronous>, transform_indices = @transform_12, window_bounds = array<i64: 1, 64>}, {transform_indices = @transform_13, window_bounds = array<i64: 16, 64>}]} {
    %c0 = arith.constant 0 : index
    %c0_0 = arith.constant 0 : index
    %0 = vector.load %arg1[%c0, %c0_0] : memref<16x64xf32, #tpu.memory_space<vmem>>, vector<16x64xf32>
    %1 = arith.truncf %0 : vector<16x64xf32> to vector<16x64xbf16>
    %c0_1 = arith.constant 0 : index
    %c0_2 = arith.constant 0 : index
    %2 = vector.load %arg2[%c0_1, %c0_2] : memref<64x192xbf16, #tpu.memory_space<vmem>>, vector<64x192xbf16>
    %cst = arith.constant dense<0.000000e+00> : vector<16x192xf32>
    %3 = tpu.matmul %1, %2, %cst {dimension_numbers = #tpu.dot_dimension_numbers<[1], [0], [0], [1], [0, 0, 1, 1], [], []>} : vector<16x64xbf16>, vector<64x192xbf16>, vector<16x192xf32> -> vector<16x192xf32>
    %c0_3 = arith.constant 0 : index
    %c0_4 = arith.constant 0 : index
    %4 = vector.load %arg3[%c0_3, %c0_4] : memref<1x192xf32, #tpu.memory_space<vmem>>, vector<1x192xf32>
    %5 = vector.broadcast %4 : vector<1x192xf32> to vector<16x192xf32>
    %6 = arith.addf %3, %5 : vector<16x192xf32>
    %7 = vector.shape_cast %6 : vector<16x192xf32> to vector<2x8x192xf32>
    %8 = arith.truncf %7 : vector<2x8x192xf32> to vector<2x8x192xbf16>
    %c0_5 = arith.constant 0 : index
    %c0_6 = arith.constant 0 : index
    %9 = vector.load %arg5[%c0_5, %c0_6] : memref<1x64xf32, #tpu.memory_space<vmem>>, vector<1x64xf32>
    %10 = vector.shape_cast %9 : vector<1x64xf32> to vector<1x1x64xf32>
    %11 = vector.shape_cast %10 : vector<1x1x64xf32> to vector<1x1x64xf32>
    %12 = vector.broadcast %11 : vector<1x1x64xf32> to vector<2x8x64xf32>
    %13 = vector.extract_strided_slice %8 {offsets = [0, 0, 0], sizes = [2, 8, 16], strides = [1, 1, 1]} : vector<2x8x192xbf16> to vector<2x8x16xbf16>
    %14 = vector.extract_strided_slice %8 {offsets = [0, 0, 64], sizes = [2, 8, 16], strides = [1, 1, 1]} : vector<2x8x192xbf16> to vector<2x8x16xbf16>
    %15 = vector.extract_strided_slice %8 {offsets = [0, 0, 128], sizes = [2, 8, 16], strides = [1, 1, 1]} : vector<2x8x192xbf16> to vector<2x8x16xbf16>
    "tpu.trace_start"() <{level = 10 : i32, message = "bqd,bkd->bqk"}> : () -> ()
    %cst_7 = arith.constant dense<0.000000e+00> : vector<2x8x8xf32>
    %16 = tpu.matmul %13, %14, %cst_7 {dimension_numbers = #tpu.dot_dimension_numbers<[2], [2], [1], [1], [0, 0, 0, 1, 1, 1], [0], [0]>} : vector<2x8x16xbf16>, vector<2x8x16xbf16>, vector<2x8x8xf32> -> vector<2x8x8xf32>
    "tpu.trace_stop"() : () -> ()
    %cst_8 = arith.constant dense<0xFF800000> : vector<2x8xf32>
    %17 = vector.multi_reduction <maximumf>, %16, %cst_8 [2] : vector<2x8x8xf32> to vector<2x8xf32>
    %18 = vector.shape_cast %17 : vector<2x8xf32> to vector<2x8x1xf32>
    %19 = vector.broadcast %18 : vector<2x8x1xf32> to vector<2x8x8xf32>
    %20 = arith.subf %16, %19 : vector<2x8x8xf32>
    %21 = math.exp %20 : vector<2x8x8xf32>
    %cst_9 = arith.constant dense<0.000000e+00> : vector<2x8xf32>
    %22 = vector.multi_reduction <add>, %21, %cst_9 [2] : vector<2x8x8xf32> to vector<2x8xf32>
    %23 = vector.shape_cast %22 : vector<2x8xf32> to vector<2x8x1xf32>
    %24 = tpu.reciprocal %23 {approx = true} : vector<2x8x1xf32> -> vector<2x8x1xf32>
    %25 = vector.broadcast %24 : vector<2x8x1xf32> to vector<2x8x8xf32>
    %26 = arith.mulf %21, %25 : vector<2x8x8xf32>
    %c0_10 = arith.constant 0 : index
    %c0_11 = arith.constant 0 : index
    %c0_12 = arith.constant 0 : index
    %27 = vector.load %arg4[%c0_10, %c0_11, %c0_12] : memref<4x16x64xbf16, #tpu.memory_space<vmem>>, vector<1x16x64xbf16>
    %28 = vector.shape_cast %27 : vector<1x16x64xbf16> to vector<16x64xbf16>
    "tpu.trace_start"() <{level = 10 : i32, message = "bkd,de->bke"}> : () -> ()
    %cst_13 = arith.constant dense<0.000000e+00> : vector<2x8x64xf32>
    %29 = tpu.matmul %15, %28, %cst_13 {dimension_numbers = #tpu.dot_dimension_numbers<[2], [0], [0, 1], [1], [0, 0, 0, 1, 1, 1], [], []>} : vector<2x8x16xbf16>, vector<16x64xbf16>, vector<2x8x64xf32> -> vector<2x8x64xf32>
    "tpu.trace_stop"() : () -> ()
    %30 = arith.truncf %26 : vector<2x8x8xf32> to vector<2x8x8xbf16>
    %31 = arith.truncf %29 : vector<2x8x64xf32> to vector<2x8x64xbf16>
    "tpu.trace_start"() <{level = 10 : i32, message = "bqk,bke->bqe"}> : () -> ()
    %cst_14 = arith.constant dense<0.000000e+00> : vector<2x8x64xf32>
    %32 = tpu.matmul %30, %31, %cst_14 {dimension_numbers = #tpu.dot_dimension_numbers<[2], [1], [1], [2], [0, 0, 0, 1, 1, 2], [0], [0]>} : vector<2x8x8xbf16>, vector<2x8x64xbf16>, vector<2x8x64xf32> -> vector<2x8x64xf32>
    "tpu.trace_stop"() : () -> ()
    %33 = arith.addf %12, %32 : vector<2x8x64xf32>
    %34 = vector.extract_strided_slice %8 {offsets = [0, 0, 16], sizes = [2, 8, 16], strides = [1, 1, 1]} : vector<2x8x192xbf16> to vector<2x8x16xbf16>
    %35 = vector.extract_strided_slice %8 {offsets = [0, 0, 80], sizes = [2, 8, 16], strides = [1, 1, 1]} : vector<2x8x192xbf16> to vector<2x8x16xbf16>
    %36 = vector.extract_strided_slice %8 {offsets = [0, 0, 144], sizes = [2, 8, 16], strides = [1, 1, 1]} : vector<2x8x192xbf16> to vector<2x8x16xbf16>
    "tpu.trace_start"() <{level = 10 : i32, message = "bqd,bkd->bqk"}> : () -> ()
    %cst_15 = arith.constant dense<0.000000e+00> : vector<2x8x8xf32>
    %37 = tpu.matmul %34, %35, %cst_15 {dimension_numbers = #tpu.dot_dimension_numbers<[2], [2], [1], [1], [0, 0, 0, 1, 1, 1], [0], [0]>} : vector<2x8x16xbf16>, vector<2x8x16xbf16>, vector<2x8x8xf32> -> vector<2x8x8xf32>
    "tpu.trace_stop"() : () -> ()
    %cst_16 = arith.constant dense<0xFF800000> : vector<2x8xf32>
    %38 = vector.multi_reduction <maximumf>, %37, %cst_16 [2] : vector<2x8x8xf32> to vector<2x8xf32>
    %39 = vector.shape_cast %38 : vector<2x8xf32> to vector<2x8x1xf32>
    %40 = vector.broadcast %39 : vector<2x8x1xf32> to vector<2x8x8xf32>
    %41 = arith.subf %37, %40 : vector<2x8x8xf32>
    %42 = math.exp %41 : vector<2x8x8xf32>
    %cst_17 = arith.constant dense<0.000000e+00> : vector<2x8xf32>
    %43 = vector.multi_reduction <add>, %42, %cst_17 [2] : vector<2x8x8xf32> to vector<2x8xf32>
    %44 = vector.shape_cast %43 : vector<2x8xf32> to vector<2x8x1xf32>
    %45 = tpu.reciprocal %44 {approx = true} : vector<2x8x1xf32> -> vector<2x8x1xf32>
    %46 = vector.broadcast %45 : vector<2x8x1xf32> to vector<2x8x8xf32>
    %47 = arith.mulf %42, %46 : vector<2x8x8xf32>
    %c1 = arith.constant 1 : index
    %c0_18 = arith.constant 0 : index
    %c0_19 = arith.constant 0 : index
    %48 = vector.load %arg4[%c1, %c0_18, %c0_19] : memref<4x16x64xbf16, #tpu.memory_space<vmem>>, vector<1x16x64xbf16>
    %49 = vector.shape_cast %48 : vector<1x16x64xbf16> to vector<16x64xbf16>
    "tpu.trace_start"() <{level = 10 : i32, message = "bkd,de->bke"}> : () -> ()
    %cst_20 = arith.constant dense<0.000000e+00> : vector<2x8x64xf32>
    %50 = tpu.matmul %36, %49, %cst_20 {dimension_numbers = #tpu.dot_dimension_numbers<[2], [0], [0, 1], [1], [0, 0, 0, 1, 1, 1], [], []>} : vector<2x8x16xbf16>, vector<16x64xbf16>, vector<2x8x64xf32> -> vector<2x8x64xf32>
    "tpu.trace_stop"() : () -> ()
    %51 = arith.truncf %47 : vector<2x8x8xf32> to vector<2x8x8xbf16>
    %52 = arith.truncf %50 : vector<2x8x64xf32> to vector<2x8x64xbf16>
    "tpu.trace_start"() <{level = 10 : i32, message = "bqk,bke->bqe"}> : () -> ()
    %cst_21 = arith.constant dense<0.000000e+00> : vector<2x8x64xf32>
    %53 = tpu.matmul %51, %52, %cst_21 {dimension_numbers = #tpu.dot_dimension_numbers<[2], [1], [1], [2], [0, 0, 0, 1, 1, 2], [0], [0]>} : vector<2x8x8xbf16>, vector<2x8x64xbf16>, vector<2x8x64xf32> -> vector<2x8x64xf32>
    "tpu.trace_stop"() : () -> ()
    %54 = arith.addf %33, %53 : vector<2x8x64xf32>
    %55 = vector.extract_strided_slice %8 {offsets = [0, 0, 32], sizes = [2, 8, 16], strides = [1, 1, 1]} : vector<2x8x192xbf16> to vector<2x8x16xbf16>
    %56 = vector.extract_strided_slice %8 {offsets = [0, 0, 96], sizes = [2, 8, 16], strides = [1, 1, 1]} : vector<2x8x192xbf16> to vector<2x8x16xbf16>
    %57 = vector.extract_strided_slice %8 {offsets = [0, 0, 160], sizes = [2, 8, 16], strides = [1, 1, 1]} : vector<2x8x192xbf16> to vector<2x8x16xbf16>
    "tpu.trace_start"() <{level = 10 : i32, message = "bqd,bkd->bqk"}> : () -> ()
    %cst_22 = arith.constant dense<0.000000e+00> : vector<2x8x8xf32>
    %58 = tpu.matmul %55, %56, %cst_22 {dimension_numbers = #tpu.dot_dimension_numbers<[2], [2], [1], [1], [0, 0, 0, 1, 1, 1], [0], [0]>} : vector<2x8x16xbf16>, vector<2x8x16xbf16>, vector<2x8x8xf32> -> vector<2x8x8xf32>
    "tpu.trace_stop"() : () -> ()
    %cst_23 = arith.constant dense<0xFF800000> : vector<2x8xf32>
    %59 = vector.multi_reduction <maximumf>, %58, %cst_23 [2] : vector<2x8x8xf32> to vector<2x8xf32>
    %60 = vector.shape_cast %59 : vector<2x8xf32> to vector<2x8x1xf32>
    %61 = vector.broadcast %60 : vector<2x8x1xf32> to vector<2x8x8xf32>
    %62 = arith.subf %58, %61 : vector<2x8x8xf32>
    %63 = math.exp %62 : vector<2x8x8xf32>
    %cst_24 = arith.constant dense<0.000000e+00> : vector<2x8xf32>
    %64 = vector.multi_reduction <add>, %63, %cst_24 [2] : vector<2x8x8xf32> to vector<2x8xf32>
    %65 = vector.shape_cast %64 : vector<2x8xf32> to vector<2x8x1xf32>
    %66 = tpu.reciprocal %65 {approx = true} : vector<2x8x1xf32> -> vector<2x8x1xf32>
    %67 = vector.broadcast %66 : vector<2x8x1xf32> to vector<2x8x8xf32>
    %68 = arith.mulf %63, %67 : vector<2x8x8xf32>
    %c2 = arith.constant 2 : index
    %c0_25 = arith.constant 0 : index
    %c0_26 = arith.constant 0 : index
    %69 = vector.load %arg4[%c2, %c0_25, %c0_26] : memref<4x16x64xbf16, #tpu.memory_space<vmem>>, vector<1x16x64xbf16>
    %70 = vector.shape_cast %69 : vector<1x16x64xbf16> to vector<16x64xbf16>
    "tpu.trace_start"() <{level = 10 : i32, message = "bkd,de->bke"}> : () -> ()
    %cst_27 = arith.constant dense<0.000000e+00> : vector<2x8x64xf32>
    %71 = tpu.matmul %57, %70, %cst_27 {dimension_numbers = #tpu.dot_dimension_numbers<[2], [0], [0, 1], [1], [0, 0, 0, 1, 1, 1], [], []>} : vector<2x8x16xbf16>, vector<16x64xbf16>, vector<2x8x64xf32> -> vector<2x8x64xf32>
    "tpu.trace_stop"() : () -> ()
    %72 = arith.truncf %68 : vector<2x8x8xf32> to vector<2x8x8xbf16>
    %73 = arith.truncf %71 : vector<2x8x64xf32> to vector<2x8x64xbf16>
    "tpu.trace_start"() <{level = 10 : i32, message = "bqk,bke->bqe"}> : () -> ()
    %cst_28 = arith.constant dense<0.000000e+00> : vector<2x8x64xf32>
    %74 = tpu.matmul %72, %73, %cst_28 {dimension_numbers = #tpu.dot_dimension_numbers<[2], [1], [1], [2], [0, 0, 0, 1, 1, 2], [0], [0]>} : vector<2x8x8xbf16>, vector<2x8x64xbf16>, vector<2x8x64xf32> -> vector<2x8x64xf32>
    "tpu.trace_stop"() : () -> ()
    %75 = arith.addf %54, %74 : vector<2x8x64xf32>
    %76 = vector.extract_strided_slice %8 {offsets = [0, 0, 48], sizes = [2, 8, 16], strides = [1, 1, 1]} : vector<2x8x192xbf16> to vector<2x8x16xbf16>
    %77 = vector.extract_strided_slice %8 {offsets = [0, 0, 112], sizes = [2, 8, 16], strides = [1, 1, 1]} : vector<2x8x192xbf16> to vector<2x8x16xbf16>
    %78 = vector.extract_strided_slice %8 {offsets = [0, 0, 176], sizes = [2, 8, 16], strides = [1, 1, 1]} : vector<2x8x192xbf16> to vector<2x8x16xbf16>
    "tpu.trace_start"() <{level = 10 : i32, message = "bqd,bkd->bqk"}> : () -> ()
    %cst_29 = arith.constant dense<0.000000e+00> : vector<2x8x8xf32>
    %79 = tpu.matmul %76, %77, %cst_29 {dimension_numbers = #tpu.dot_dimension_numbers<[2], [2], [1], [1], [0, 0, 0, 1, 1, 1], [0], [0]>} : vector<2x8x16xbf16>, vector<2x8x16xbf16>, vector<2x8x8xf32> -> vector<2x8x8xf32>
    "tpu.trace_stop"() : () -> ()
    %cst_30 = arith.constant dense<0xFF800000> : vector<2x8xf32>
    %80 = vector.multi_reduction <maximumf>, %79, %cst_30 [2] : vector<2x8x8xf32> to vector<2x8xf32>
    %81 = vector.shape_cast %80 : vector<2x8xf32> to vector<2x8x1xf32>
    %82 = vector.broadcast %81 : vector<2x8x1xf32> to vector<2x8x8xf32>
    %83 = arith.subf %79, %82 : vector<2x8x8xf32>
    %84 = math.exp %83 : vector<2x8x8xf32>
    %cst_31 = arith.constant dense<0.000000e+00> : vector<2x8xf32>
    %85 = vector.multi_reduction <add>, %84, %cst_31 [2] : vector<2x8x8xf32> to vector<2x8xf32>
    %86 = vector.shape_cast %85 : vector<2x8xf32> to vector<2x8x1xf32>
    %87 = tpu.reciprocal %86 {approx = true} : vector<2x8x1xf32> -> vector<2x8x1xf32>
    %88 = vector.broadcast %87 : vector<2x8x1xf32> to vector<2x8x8xf32>
    %89 = arith.mulf %84, %88 : vector<2x8x8xf32>
    %c3 = arith.constant 3 : index
    %c0_32 = arith.constant 0 : index
    %c0_33 = arith.constant 0 : index
    %90 = vector.load %arg4[%c3, %c0_32, %c0_33] : memref<4x16x64xbf16, #tpu.memory_space<vmem>>, vector<1x16x64xbf16>
    %91 = vector.shape_cast %90 : vector<1x16x64xbf16> to vector<16x64xbf16>
    "tpu.trace_start"() <{level = 10 : i32, message = "bkd,de->bke"}> : () -> ()
    %cst_34 = arith.constant dense<0.000000e+00> : vector<2x8x64xf32>
    %92 = tpu.matmul %78, %91, %cst_34 {dimension_numbers = #tpu.dot_dimension_numbers<[2], [0], [0, 1], [1], [0, 0, 0, 1, 1, 1], [], []>} : vector<2x8x16xbf16>, vector<16x64xbf16>, vector<2x8x64xf32> -> vector<2x8x64xf32>
    "tpu.trace_stop"() : () -> ()
    %93 = arith.truncf %89 : vector<2x8x8xf32> to vector<2x8x8xbf16>
    %94 = arith.truncf %92 : vector<2x8x64xf32> to vector<2x8x64xbf16>
    "tpu.trace_start"() <{level = 10 : i32, message = "bqk,bke->bqe"}> : () -> ()
    %cst_35 = arith.constant dense<0.000000e+00> : vector<2x8x64xf32>
    %95 = tpu.matmul %93, %94, %cst_35 {dimension_numbers = #tpu.dot_dimension_numbers<[2], [1], [1], [2], [0, 0, 0, 1, 1, 2], [0], [0]>} : vector<2x8x8xbf16>, vector<2x8x64xbf16>, vector<2x8x64xf32> -> vector<2x8x64xf32>
    "tpu.trace_stop"() : () -> ()
    %96 = arith.addf %75, %95 : vector<2x8x64xf32>
    %97 = vector.shape_cast %96 : vector<2x8x64xf32> to vector<16x64xf32>
    %98 = arith.addf %0, %97 : vector<16x64xf32>
    %c0_36 = arith.constant 0 : index
    %c0_37 = arith.constant 0 : index
    %99 = vector.load %arg6[%c0_36, %c0_37] : memref<1x64xf32, #tpu.memory_space<vmem>>, vector<1x64xf32>
    %c0_38 = arith.constant 0 : index
    %c0_39 = arith.constant 0 : index
    %100 = vector.load %arg7[%c0_38, %c0_39] : memref<1x64xf32, #tpu.memory_space<vmem>>, vector<1x64xf32>
    %cst_40 = arith.constant dense<0.000000e+00> : vector<16xf32>
    %101 = vector.multi_reduction <add>, %98, %cst_40 [1] : vector<16x64xf32> to vector<16xf32>
    %102 = vector.shape_cast %101 : vector<16xf32> to vector<16x1xf32>
    %cst_41 = arith.constant 6.400000e+01 : f32
    %103 = vector.broadcast %cst_41 : f32 to vector<16x1xf32>
    %104 = arith.divf %102, %103 : vector<16x1xf32>
    %105 = vector.broadcast %104 : vector<16x1xf32> to vector<16x64xf32>
    %106 = arith.subf %98, %105 : vector<16x64xf32>
    %107 = arith.mulf %106, %106 : vector<16x64xf32>
    %cst_42 = arith.constant dense<0.000000e+00> : vector<16xf32>
    %108 = vector.multi_reduction <add>, %107, %cst_42 [1] : vector<16x64xf32> to vector<16xf32>
    %109 = vector.shape_cast %108 : vector<16xf32> to vector<16x1xf32>
    %cst_43 = arith.constant 6.400000e+01 : f32
    %110 = vector.broadcast %cst_43 : f32 to vector<16x1xf32>
    %111 = arith.divf %109, %110 : vector<16x1xf32>
    %112 = vector.broadcast %104 : vector<16x1xf32> to vector<16x64xf32>
    %113 = arith.subf %98, %112 : vector<16x64xf32>
    %cst_44 = arith.constant 9.99999974E-6 : f32
    %114 = vector.broadcast %cst_44 : f32 to vector<16x1xf32>
    %115 = arith.addf %111, %114 : vector<16x1xf32>
    %116 = math.rsqrt %115 : vector<16x1xf32>
    %117 = vector.broadcast %116 : vector<16x1xf32> to vector<16x64xf32>
    %118 = arith.mulf %113, %117 : vector<16x64xf32>
    %119 = vector.broadcast %99 : vector<1x64xf32> to vector<16x64xf32>
    %120 = arith.mulf %118, %119 : vector<16x64xf32>
    %121 = vector.broadcast %100 : vector<1x64xf32> to vector<16x64xf32>
    %122 = arith.addf %120, %121 : vector<16x64xf32>
    %123 = arith.truncf %122 : vector<16x64xf32> to vector<16x64xbf16>
    %c0_45 = arith.constant 0 : index
    %c0_46 = arith.constant 0 : index
    %124 = vector.load %arg8[%c0_45, %c0_46] : memref<64x128xbf16, #tpu.memory_space<vmem>>, vector<64x128xbf16>
    %cst_47 = arith.constant dense<0.000000e+00> : vector<16x128xf32>
    %125 = tpu.matmul %123, %124, %cst_47 {dimension_numbers = #tpu.dot_dimension_numbers<[1], [0], [0], [1], [0, 0, 1, 1], [], []>} : vector<16x64xbf16>, vector<64x128xbf16>, vector<16x128xf32> -> vector<16x128xf32>
    %c0_48 = arith.constant 0 : index
    %c0_49 = arith.constant 0 : index
    %126 = vector.load %arg9[%c0_48, %c0_49] : memref<1x128xf32, #tpu.memory_space<vmem>>, vector<1x128xf32>
    %127 = vector.broadcast %126 : vector<1x128xf32> to vector<16x128xf32>
    %128 = arith.addf %125, %127 : vector<16x128xf32>
    %cst_50 = arith.constant 0.000000e+00 : f32
    %129 = vector.broadcast %cst_50 : f32 to vector<16x128xf32>
    %130 = arith.maximumf %128, %129 : vector<16x128xf32>
    %131 = arith.truncf %130 : vector<16x128xf32> to vector<16x128xbf16>
    %c0_51 = arith.constant 0 : index
    %c0_52 = arith.constant 0 : index
    %132 = vector.load %arg10[%c0_51, %c0_52] : memref<128x64xbf16, #tpu.memory_space<vmem>>, vector<128x64xbf16>
    %cst_53 = arith.constant dense<0.000000e+00> : vector<16x64xf32>
    %133 = tpu.matmul %131, %132, %cst_53 {dimension_numbers = #tpu.dot_dimension_numbers<[1], [0], [0], [1], [0, 0, 1, 1], [], []>} : vector<16x128xbf16>, vector<128x64xbf16>, vector<16x64xf32> -> vector<16x64xf32>
    %c0_54 = arith.constant 0 : index
    %c0_55 = arith.constant 0 : index
    %134 = vector.load %arg11[%c0_54, %c0_55] : memref<1x64xf32, #tpu.memory_space<vmem>>, vector<1x64xf32>
    %135 = vector.broadcast %134 : vector<1x64xf32> to vector<16x64xf32>
    %136 = arith.addf %133, %135 : vector<16x64xf32>
    %137 = arith.addf %122, %136 : vector<16x64xf32>
    %c0_56 = arith.constant 0 : index
    %c0_57 = arith.constant 0 : index
    %138 = vector.load %arg12[%c0_56, %c0_57] : memref<1x64xf32, #tpu.memory_space<vmem>>, vector<1x64xf32>
    %c0_58 = arith.constant 0 : index
    %c0_59 = arith.constant 0 : index
    %139 = vector.load %arg13[%c0_58, %c0_59] : memref<1x64xf32, #tpu.memory_space<vmem>>, vector<1x64xf32>
    %cst_60 = arith.constant dense<0.000000e+00> : vector<16xf32>
    %140 = vector.multi_reduction <add>, %137, %cst_60 [1] : vector<16x64xf32> to vector<16xf32>
    %141 = vector.shape_cast %140 : vector<16xf32> to vector<16x1xf32>
    %cst_61 = arith.constant 6.400000e+01 : f32
    %142 = vector.broadcast %cst_61 : f32 to vector<16x1xf32>
    %143 = arith.divf %141, %142 : vector<16x1xf32>
    %144 = vector.broadcast %143 : vector<16x1xf32> to vector<16x64xf32>
    %145 = arith.subf %137, %144 : vector<16x64xf32>
    %146 = arith.mulf %145, %145 : vector<16x64xf32>
    %cst_62 = arith.constant dense<0.000000e+00> : vector<16xf32>
    %147 = vector.multi_reduction <add>, %146, %cst_62 [1] : vector<16x64xf32> to vector<16xf32>
    %148 = vector.shape_cast %147 : vector<16xf32> to vector<16x1xf32>
    %cst_63 = arith.constant 6.400000e+01 : f32
    %149 = vector.broadcast %cst_63 : f32 to vector<16x1xf32>
    %150 = arith.divf %148, %149 : vector<16x1xf32>
    %151 = vector.broadcast %143 : vector<16x1xf32> to vector<16x64xf32>
    %152 = arith.subf %137, %151 : vector<16x64xf32>
    %cst_64 = arith.constant 9.99999974E-6 : f32
    %153 = vector.broadcast %cst_64 : f32 to vector<16x1xf32>
    %154 = arith.addf %150, %153 : vector<16x1xf32>
    %155 = math.rsqrt %154 : vector<16x1xf32>
    %156 = vector.broadcast %155 : vector<16x1xf32> to vector<16x64xf32>
    %157 = arith.mulf %152, %156 : vector<16x64xf32>
    %158 = vector.broadcast %138 : vector<1x64xf32> to vector<16x64xf32>
    %159 = arith.mulf %157, %158 : vector<16x64xf32>
    %160 = vector.broadcast %139 : vector<1x64xf32> to vector<16x64xf32>
    %161 = arith.addf %159, %160 : vector<16x64xf32>
    %c0_65 = arith.constant 0 : index
    %c0_66 = arith.constant 0 : index
    %162 = vector.load %arg14[%c0_65, %c0_66] : memref<16x64xf32, #tpu.memory_space<vmem>>, vector<16x64xf32>
    tpu.vector_store %arg14[%c0_65, %c0_66], %161 {strides = array<i32>} : memref<16x64xf32, #tpu.memory_space<vmem>>, vector<16x64xf32>,
    return
  }
  func.func @transform_0(%arg0: i32) -> (i32, i32) {
    %c0_i32 = arith.constant 0 : i32
    %c0_i32_0 = arith.constant 0 : i32
    return %arg0, %c0_i32 : i32, i32
  }
  func.func @transform_1(%arg0: i32) -> (i32, i32) {
    %c0_i32 = arith.constant 0 : i32
    %c0_i32_0 = arith.constant 0 : i32
    %c0_i32_1 = arith.constant 0 : i32
    return %c0_i32, %c0_i32_0 : i32, i32
  }
  func.func @transform_2(%arg0: i32) -> (i32, i32) {
    %c0_i32 = arith.constant 0 : i32
    %c0_i32_0 = arith.constant 0 : i32
    %c0_i32_1 = arith.constant 0 : i32
    return %c0_i32, %c0_i32_0 : i32, i32
  }
  func.func @transform_3(%arg0: i32) -> (i32, i32, i32) {
    %c0_i32 = arith.constant 0 : i32
    %c0_i32_0 = arith.constant 0 : i32
    %c0_i32_1 = arith.constant 0 : i32
    %c0_i32_2 = arith.constant 0 : i32
    return %c0_i32, %c0_i32_0, %c0_i32_1 : i32, i32, i32
  }
  func.func @transform_4(%arg0: i32) -> (i32, i32) {
    %c0_i32 = arith.constant 0 : i32
    %c0_i32_0 = arith.constant 0 : i32
    %c0_i32_1 = arith.constant 0 : i32
    return %c0_i32, %c0_i32_0 : i32, i32
  }
  func.func @transform_5(%arg0: i32) -> (i32, i32) {
    %c0_i32 = arith.constant 0 : i32
    %c0_i32_0 = arith.constant 0 : i32
    %c0_i32_1 = arith.constant 0 : i32
    return %c0_i32, %c0_i32_0 : i32, i32
  }
  func.func @transform_6(%arg0: i32) -> (i32, i32) {
    %c0_i32 = arith.constant 0 : i32
    %c0_i32_0 = arith.constant 0 : i32
    %c0_i32_1 = arith.constant 0 : i32
    return %c0_i32, %c0_i32_0 : i32, i32
  }
  func.func @transform_7(%arg0: i32) -> (i32, i32) {
    %c0_i32 = arith.constant 0 : i32
    %c0_i32_0 = arith.constant 0 : i32
    %c0_i32_1 = arith.constant 0 : i32
    return %c0_i32, %c0_i32_0 : i32, i32
  }
  func.func @transform_8(%arg0: i32) -> (i32, i32) {
    %c0_i32 = arith.constant 0 : i32
    %c0_i32_0 = arith.constant 0 : i32
    %c0_i32_1 = arith.constant 0 : i32
    return %c0_i32, %c0_i32_0 : i32, i32
  }
  func.func @transform_9(%arg0: i32) -> (i32, i32) {
    %c0_i32 = arith.constant 0 : i32
    %c0_i32_0 = arith.constant 0 : i32
    %c0_i32_1 = arith.constant 0 : i32
    return %c0_i32, %c0_i32_0 : i32, i32
  }
  func.func @transform_10(%arg0: i32) -> (i32, i32) {
    %c0_i32 = arith.constant 0 : i32
    %c0_i32_0 = arith.constant 0 : i32
    %c0_i32_1 = arith.constant 0 : i32
    return %c0_i32, %c0_i32_0 : i32, i32
  }
  func.func @transform_11(%arg0: i32) -> (i32, i32) {
    %c0_i32 = arith.constant 0 : i32
    %c0_i32_0 = arith.constant 0 : i32
    %c0_i32_1 = arith.constant 0 : i32
    return %c0_i32, %c0_i32_0 : i32, i32
  }
  func.func @transform_12(%arg0: i32) -> (i32, i32) {
    %c0_i32 = arith.constant 0 : i32
    %c0_i32_0 = arith.constant 0 : i32
    %c0_i32_1 = arith.constant 0 : i32
    return %c0_i32, %c0_i32_0 : i32, i32
  }
  func.func @transform_13(%arg0: i32) -> (i32, i32) {
    %c0_i32 = arith.constant 0 : i32
    %c0_i32_0 = arith.constant 0 : i32
    return %arg0, %c0_i32 : i32, i32
  }
}

</mosaic_0001>

<bundles_post_ra>
// kernel: tpu_custom_call.1
= control target key start
LH: loop header
LB: loop body
LE: loop exit
PB: predicated region body
PF: predicated region fallthrough
CT: control target
= control target key end

     0   :  { %18 = vsyncpa [#allocation3], 0  ;;  %s2405_s0 = inlined_call_operand.hbm [shape: f32[16,64], index: 0, kind: input, shape index: {}]   ;;  %s2406_s1 = inlined_call_operand.vmem [shape: bf16[64,192], index: 1, kind: input, shape index: {}]   ;;  %s2407_s2 = inlined_call_operand.vmem [shape: f32[1,192], index: 2, kind: input, shape index: {}]   ;;  %s2408_s3 = inlined_call_operand.vmem [shape: bf16[4,16,64], index: 3, kind: input, shape index: {}]   ;;  %s2409_s4 = inlined_call_operand.vmem [shape: f32[1,64], index: 4, kind: input, shape index: {}]   ;;  %s2410_s5 = inlined_call_operand.vmem [shape: f32[1,64], index: 5, kind: input, shape index: {}]   ;;  %s2411_s6 = inlined_call_operand.vmem [shape: f32[1,64], index: 6, kind: input, shape index: {}]   ;;  %s2412_s7 = inlined_call_operand.hbm [shape: bf16[64,128], index: 7, kind: input, shape index: {}]   ;;  %s2413_s8 = inlined_call_operand.vmem [shape: f32[1,128], index: 8, kind: input, shape index: {}]   ;;  %s2414_s9 = inlined_call_operand.vmem [shape: bf16[128,64], index: 9, kind: input, shape index: {}]   ;;  %s2415_s10 = inlined_call_operand.vmem [shape: f32[1,64], index: 10, kind: input, shape index: {}]   ;;  %s2416_s11 = inlined_call_operand.vmem [shape: f32[1,64], index: 11, kind: input, shape index: {}]   ;;  %s2417_s12 = inlined_call_operand.vmem [shape: f32[1,64], index: 12, kind: input, shape index: {}]   ;;  %s2418_s13 = inlined_call_operand.hbm [shape: f32[16,64], index: 13, kind: output, shape index: {}]  }
   0x1   :  { %19 = vsyncpa [#allocation6], 0 }
   0x2   :  { %20 = vsyncpa [#allocation4], 0  ;;  %s2027_s25 = smov [#allocation2]  }
   0x3   :  { %s26_s26 = sshll.u32 %s2027_s25, 4  ;;  %s27_s26 = int_to_ptr.vmem [resolvable:$true] %s26_s26 }
   0x4   :  { %s1969_s27 = scalar_lea.vmem %s27_s26, 256  ;;  %p1974_p1 = scmp.lt.s32.totalorder %s27_s26, %s27_s26 }
   0x5   :  { %p1970_p0 = scmp.ne.s32.totalorder %s27_s26, %s1969_s27  ;;  %p1975_p2 = scmp.lt.s32.totalorder %s1969_s27, %s1969_s27 }
   0x7   :  { %p1976_p3 = por %p1975_p2, %p1974_p1 }
   0x9   :  { %p1977_p4 = pnand %p1976_p3, %p1970_p0 }
   0xb   :  { %1980 = shalt.err (!%p1977_p4)
}
   0xc   :  { %s2028_s28 = smov 128   ;;  %s2029_s29 = smov 8  }
   0xd   :  { %32 = dma.hbm_to_vmem [thread:$0]  %s2405_s0, 256, %s27_s26, [#allocation3], %s2028_s28, %s2028_s28, %s2029_s29  }
   0xe   :  { %s2030_s15 = smov [#allocation5]  }
   0xf   :  { %s50_s16 = sshll.u32 %s2030_s15, 4  ;;  %s51_s16 = int_to_ptr.vmem [resolvable:$true] %s50_s16 }
  0x10   :  { %s1989_s17 = scalar_lea.vmem %s51_s16, 512  ;;  %p1994_p6 = scmp.lt.s32.totalorder %s51_s16, %s51_s16 }
  0x11   :  { %p1990_p5 = scmp.ne.s32.totalorder %s51_s16, %s1989_s17  ;;  %p1995_p7 = scmp.lt.s32.totalorder %s1989_s17, %s1989_s17 }
  0x13   :  { %p1996_p8 = por %p1995_p7, %p1994_p6 }
  0x15   :  { %p1997_p9 = pnand %p1996_p8, %p1990_p5 }
  0x17   :  { %2000 = shalt.err (!%p1997_p9)
}
  0x18   :  { %s2031_s18 = smov 64   ;;  %s2032_s19 = smov 4  }
  0x19   :  { %56 = dma.hbm_to_vmem [thread:$0]  %s2412_s7, 512, %s51_s16, [#allocation6], %s2031_s18, %s2031_s18, %s2032_s19  }
  0x1a   :  { %2021 = dma.done.wait [#allocation3], 256  }
  0x1b   :  { %2022 = vsyncadd [#allocation3], 4294967040 }
  0x1c   :  { %2023 = dma.done.wait [#allocation6], 512  }
  0x1d   :  { %2024 = vsyncadd [#allocation6], 4294966784  ;;  %v2033_v0 = vmov 0   ;;  %v1893_v1 = vld [vmem:[%s2406_s1 + $0x34] ss:$8 sps:$4 sm:$0xff]   ;;  %vm137_vm0 = vcmask 523264   ;;  %v87_v12 = vlaneseq }
  0x1e   :  { %173 = vmatprep.mubr.bf16.mxu0 %v2033_v0  ;;  %v1895_v2 = vld [vmem:[%s2406_s1 + $0x30] ss:$8 sps:$4 sm:$0xff]   ;;  %149 = vmatprep.subr.bf16.mxu0 %v1893_v1  ;;  %v1896_v3 = vld [vmem:[%s2406_s1 + $0x24] ss:$8 sps:$4 sm:$0xff]   ;;  %v1898_v4 = vld [vmem:[%s2406_s1 + $0x20] ss:$8 sps:$4 sm:$0xff]  }
  0x1f   :  { %150 = vmatpush1.bf16.msra.mxu0 %v1895_v2  ;;  %v1899_v5 = vld [vmem:[%s2406_s1 + $0x14] ss:$8 sps:$4 sm:$0xff]   ;;  %v1901_v6 = vld [vmem:[%s2406_s1 + $0x10] ss:$8 sps:$4 sm:$0xff]   ;;  %v1902_v7 = vld [vmem:[%s2406_s1 + $0x4] ss:$8 sps:$4 sm:$0xff]  }
  0x20   :  { %151 = vmatprep.subr.bf16.mxu0 %v1896_v3  ;;  %v1904_v8 = vld [vmem:[%s2406_s1] ss:$8 sps:$4 sm:$0xff]   ;;  %v88_v13 = vshrl.u32 %v87_v12, 7  ;;  %v2034_v14 = vmov 0.0   ;;  %vm2035_vm1 = vmmov 0   ;;  %vm198_vm2 = vcmask 130048  }
  0x21   :  { %v2148_v9 = vld [vmem:[#allocation2] sm:$0xff]  ;;  %v2150_v10 = vld [vmem:[#allocation2 + $0x8] sm:$0xff]  ;;  %1731 = vmatprep.subr.bf16.mxu1 %v2034_v14  ;;  %1733 = vmatprep.mubr.msk.bf16.mxu1 %vm2035_vm1, %v2034_v14  ;;  %vm294_vm3 = vcmask 64512   ;;  %vm381_vm4 = vcmask 1043456   ;;  %s2037_s23 = smov 112   ;;  %s2038_s26 = smov 32  }
  0x22   :  { %v76_v11 = vpack.c.bf16 %v2150_v10, %v2148_v9  ;;  %v89_v15 = vsub.s32 0, %v88_v13  ;;  %v85_v16 = vld [vmem:[%s2407_s2] sm:$0x3]  ;;  %v93_v28 = vsub.s32 1, %v88_v13  ;;  %s2039_s7 = smov 96   ;;  %s2041_s16 = smov 80  }
  0x23   :  { %152 = vmatpush1.bf16.msra.mxu0 %v1898_v4  ;;  %v1905_v30 = vld [vmem:[%s2408_s3] sm:$0xff]   ;;  %s2042_s21 = smov [#allocation7]  }
  0x24   :  { %153 = vmatprep.subr.bf16.mxu0 %v1899_v5  ;;  %v90_v17 = vrot.slane %v85_v16, %v89_v15  ;;  %v94_v32 = vrot.slane %v85_v16, %v93_v28  ;;  %v1906_v16 = vld [vmem:[%s2408_s3 + $0x8] sm:$0xff]   ;;  %s1597_s1 = sshll.u32 %s2042_s21, 4  ;;  %s1598_s1 = int_to_ptr.vmem [resolvable:$true] %s1597_s1 }
  0x25   :  { %s2001_s0 = scalar_lea.vmem %s1598_s1, 256  ;;  %p2006_p11 = scmp.lt.s32.totalorder %s1598_s1, %s1598_s1 }
  0x26   :  { %p2002_p10 = scmp.ne.s32.totalorder %s1598_s1, %s2001_s0  ;;  %p2007_p12 = scmp.lt.s32.totalorder %s2001_s0, %s2001_s0 }
  0x27   :  { %154 = vmatpush1.bf16.msra.mxu0 %v1901_v6 }
  0x28   :  { %155 = vmatprep.subr.bf16.mxu0 %v1902_v7  ;;  %p2008_p13 = por %p2007_p12, %p2006_p11 }
  0x2a   :  { %p2009_p0 = pnand %p2008_p13, %p2002_p10 }
  0x2b   :  { %156 = vmatpush1.bf16.msra.mxu0 %v1904_v8 }
  0x2c   :  { %1725 = vmatprep.subr.bf16.mxu0 %v2034_v14 }
  0x2e   :  { %1618 = vmatmul.mubr.msk.bf16.vlgmr.msra.gmra.mxu0 %vm137_vm0, %v76_v11 }
  0x2f   :  { %1727 = vmatprep.mubr.msk.bf16.mxu0 %vm2035_vm1, %v2034_v14 }
  0xee   :  { %v175_v18 = vpop.f32.mrf.mxu0 }
  0xef   :  { %v176_v19 = vadd.f32 %v175_v18, %v90_v17 }
  0xf0   :  { %v177_v20 = vpop.f32.mrf.mxu0 }
  0xf1   :  { %v2164_v21 = vpack.c.bf16 %v176_v19, %v176_v19  ;;  %v178_v34 = vadd.f32 %v177_v20, %v94_v32 }
  0xf2   :  { %v179_v22 = vpop.f32.mrf.mxu0 }
  0xf3   :  { %v180_v23 = vadd.f32 %v179_v22, %v90_v17  ;;  %196 = vrot.lane.b32.xlu0 %v2164_v21, %s2031_s18 }
  0xf4   :  { %v181_v31 = vpop.f32.mrf.mxu0 }
  0xf5   :  { %v2168_v24 = vpack.c.bf16 %v180_v23, %v180_v23  ;;  %v182_v33 = vadd.f32 %v181_v31, %v94_v32 }
  0xf7   :  { %246 = vrot.lane.b32.xlu0 %v2168_v24, %s2031_s18  ;;  %v2188_v35 = vpack.c.bf16 %v182_v33, %v178_v34  ;;  %s2036_s18 = smov 48  }
 0x165   :  { %v197_v25 = vpop.permute.xlu0 %196 }
 0x166   :  { %v203_v26 = vsel %vm198_vm2, %v197_v25, 0 }
 0x167   :  { %1726 = vmatpush3.bf16.xpose.msra.mxu0 %v203_v26 }
 0x168   :  { %1737 = vmatprep.subr.bf16.mxu0 %v2034_v14 }
 0x169   :  { %v247_v27 = vpop.permute.xlu0 %246 }
 0x16a   :  { %v252_v29 = vsel %vm198_vm2, %v247_v27, 0 }
 0x16b   :  { %1732 = vmatpush3.bf16.xpose.msra.mxu1 %v252_v29 }
 0x16c   :  { %1743 = vmatprep.subr.bf16.mxu1 %v2034_v14 }
 0x16e   :  { %1728 = vmatmul.mubr.msk.bf16.vlgmr.msra.gmra.mxu0 %vm198_vm2, %v2164_v21 }
 0x16f   :  { %1738 = vmatpush3.bf16.msra.mxu0 %v1905_v30  ;;  %1739 = vmatprep.mubr.msk.bf16.mxu0 %vm2035_vm1, %v2034_v14 }
 0x170   :  { %1749 = vmatprep.subr.bf16.mxu0 %v2034_v14 }
 0x172   :  { %1734 = vmatmul.mubr.msk.bf16.vlgmr.msra.gmra.mxu1 %vm198_vm2, %v2168_v24 }
 0x173   :  { %1745 = vmatprep.mubr.msk.bf16.mxu1 %vm2035_vm1, %v2034_v14 }
 0x176   :  { %1740 = vmatmul.mubr.msk.bf16.vlgmr.msra.gmra.mxu0 %vm198_vm2, %v2188_v35 }
 0x177   :  { %1751 = vmatprep.mubr.msk.bf16.mxu0 %vm2035_vm1, %v2034_v14 }
 0x22e   :  { %v239_v36 = vpop.f32.mrf.mxu0 }
 0x22f   :  { %v295_v37 = vsel %vm294_vm3, %v239_v36, -inf }
 0x230   :  { %296 = vmax.xlane.f32.xlu1 %v295_v37  ;;  %v1729_v38 = vpop.f32.mrf.mxu0 }
 0x232   :  { %v242_v39 = vpop.f32.mrf.mxu0  ;;  %v288_v40 = vpop.f32.mrf.mxu1 }
 0x233   :  { %v298_v41 = vsel %vm294_vm3, %v288_v40, -inf }
 0x234   :  { %v1730_v42 = vpop.f32.mrf.mxu0  ;;  %299 = vmax.xlane.f32.xlu1 %v298_v41  ;;  %v1735_v43 = vpop.f32.mrf.mxu1 }
 0x236   :  { %v291_v44 = vpop.f32.mrf.mxu1  ;;  %v367_v45 = vpop.f32.mrf.mxu0 }
 0x237   :  { %v376_v46 = vpack.c.bf16 %v367_v45, %v367_v45 }
 0x238   :  { %v1736_v47 = vpop.f32.mrf.mxu1  ;;  %v1741_v48 = vpop.f32.mrf.mxu0 }
 0x239   :  { %v383_v49 = vsel %vm381_vm4, %v376_v46, 0 }
 0x23a   :  { %v370_v50 = vpop.f32.mrf.mxu0  ;;  %1744 = vmatpush3.bf16.msra.mxu1 %v383_v49 }
 0x23b   :  { %v377_v51 = vpack.c.bf16 %v370_v50, %v370_v50  ;;  %1755 = vmatprep.subr.bf16.mxu1 %v2034_v14 }
 0x23c   :  { %v1742_v52 = vpop.f32.mrf.mxu0 }
 0x23d   :  { %v429_v53 = vsel %vm381_vm4, %v377_v51, 0 }
 0x23e   :  { %1750 = vmatpush3.bf16.msra.mxu0 %v429_v53 }
 0x23f   :  { %1761 = vmatprep.subr.bf16.mxu0 %v2034_v14 }
 0x245   :  { %475 = vrot.lane.b32.xlu1 %v2164_v21, %s2036_s18 }
 0x249   :  { %525 = vrot.lane.b32.xlu1 %v2168_v24, %s2036_s18 }
 0x2b9   :  { %v297_v54 = vpop.xlane.xlu1 %296 }
 0x2ba   :  { %v301_v55 = vsub.f32 %v239_v36, %v297_v54 }
 0x2bc   :  { %v303_v56 = vmul.f32 1.442695, %v301_v55 }
 0x2bd   :  { %v300_v57 = vpop.xlane.xlu1 %299 }
 0x2be   :  { %1921 = vpow2.f32 %v303_v56  ;;  %v302_v58 = vsub.f32 %v288_v40, %v300_v57 }
 0x2c0   :  { %v305_v59 = vmul.f32 1.442695, %v302_v58 }
 0x2c1   :  { %v476_v0 = vpop.permute.xlu1 %475 }
 0x2c2   :  { %1923 = vpow2.f32 %v305_v59  ;;  %v481_v8 = vsel %vm198_vm2, %v476_v0, 0 }
 0x2c5   :  { %v526_v1 = vpop.permute.xlu1 %525 }
 0x2c6   :  { %v531_v13 = vsel %vm198_vm2, %v526_v1, 0 }
 0x2cb   :  { %v1922_v60 = vpop.eup %1921 }
 0x2cc   :  { %v307_v61 = vsel %vm294_vm3, %v1922_v60, 0.0 }
 0x2cd   :  { %308 = vadd.xlane.f32.xlu0 %v307_v61 }
 0x2cf   :  { %v1924_v62 = vpop.eup %1923 }
 0x2d0   :  { %v310_v63 = vsel %vm294_vm3, %v1924_v62, 0.0 }
 0x2d1   :  { %311 = vadd.xlane.f32.xlu1 %v310_v63 }
 0x2e2   :  { %473 = vrot.lane.b32.xlu1 %v2164_v21, %s2037_s23 }
 0x2e3   :  { %598 = vrot.lane.b32.xlu0 %v2188_v35, %s2037_s23 }
 0x2e6   :  { %523 = vrot.lane.b32.xlu1 %v2168_v24, %s2037_s23 }
 0x356   :  { %v309_v2 = vpop.xlane.xlu0 %308 }
 0x357   :  { %1925 = vrcp.f32 %v309_v2 }
 0x35a   :  { %v312_v3 = vpop.xlane.xlu1 %311  ;;  %v599_v18 = vpop.permute.xlu0 %598 }
 0x35b   :  { %1927 = vrcp.f32 %v312_v3 }
 0x35e   :  { %v474_v15 = vpop.permute.xlu1 %473 }
 0x362   :  { %v524_v17 = vpop.permute.xlu1 %523 }
 0x364   :  { %v1926_v4 = vpop.eup %1925 }
 0x365   :  { %v315_v5 = vmul.f32 %v1926_v4, %v1922_v60 }
 0x367   :  { %v374_v6 = vpack.c.bf16 %v315_v5, %v315_v5 }
 0x368   :  { %v1928_v7 = vpop.eup %1927 }
 0x369   :  { %1746 = vmatmul.mubr.msk.bf16.vlgmr.msra.gmra.mxu1 %vm294_vm3, %v374_v6  ;;  %v316_v11 = vmul.f32 %v1928_v7, %v1924_v62  ;;  %v1907_v7 = vld [vmem:[%s2408_s3 + $0x10] sm:$0xff]  }
 0x36a   :  { %1756 = vmatpush3.bf16.xpose.msra.mxu1 %v481_v8  ;;  %1757 = vmatprep.mubr.msk.bf16.mxu1 %vm2035_vm1, %v2034_v14 }
 0x36b   :  { %v375_v12 = vpack.c.bf16 %v316_v11, %v316_v11  ;;  %1767 = vmatprep.subr.bf16.mxu1 %v2034_v14 }
 0x36d   :  { %1752 = vmatmul.mubr.msk.bf16.vlgmr.msra.gmra.mxu0 %vm294_vm3, %v375_v12  ;;  %v1619_v12 = vld [vmem:[%s2409_s4] ss:$0 sm:$0xff]  ;;  %s2040_s4 = smov 16  }
 0x36e   :  { %1762 = vmatpush3.bf16.xpose.msra.mxu0 %v531_v13  ;;  %1763 = vmatprep.mubr.msk.bf16.mxu0 %vm2035_vm1, %v2034_v14 }
 0x36f   :  { %1773 = vmatprep.subr.bf16.mxu0 %v2034_v14 }
 0x371   :  { %1758 = vmatmul.mubr.msk.bf16.vlgmr.msra.gmra.mxu1 %vm198_vm2, %v474_v15 }
 0x372   :  { %1768 = vmatpush3.bf16.msra.mxu1 %v1906_v16  ;;  %1769 = vmatprep.mubr.msk.bf16.mxu1 %vm2035_vm1, %v2034_v14 }
 0x373   :  { %1779 = vmatprep.subr.bf16.mxu1 %v2034_v14 }
 0x375   :  { %1764 = vmatmul.mubr.msk.bf16.vlgmr.msra.gmra.mxu0 %vm198_vm2, %v524_v17 }
 0x376   :  { %1775 = vmatprep.mubr.msk.bf16.mxu0 %vm2035_vm1, %v2034_v14 }
 0x379   :  { %1770 = vmatmul.mubr.msk.bf16.vlgmr.msra.gmra.mxu1 %vm198_vm2, %v599_v18 }
 0x37a   :  { %1781 = vmatprep.mubr.msk.bf16.mxu1 %vm2035_vm1, %v2034_v14 }
 0x429   :  { %v2230_v19 = vpop.f32.mrf.mxu1 }
 0x42a   :  { %v471_v13 = vadd.f32 %v1619_v12, %v2230_v19 }
 0x42b   :  { %v1747_v20 = vpop.f32.mrf.mxu1 }
 0x42d   :  { %v422_v22 = vpop.f32.mrf.mxu1  ;;  %v2232_v23 = vpop.f32.mrf.mxu0 }
 0x42e   :  { %v472_v18 = vadd.f32 %v1619_v12, %v2232_v23 }
 0x42f   :  { %v1748_v25 = vpop.f32.mrf.mxu1  ;;  %v1753_v26 = vpop.f32.mrf.mxu0 }
 0x431   :  { %v468_v27 = vpop.f32.mrf.mxu0  ;;  %v517_v28 = vpop.f32.mrf.mxu1 }
 0x432   :  { %v573_v29 = vsel %vm294_vm3, %v517_v28, -inf }
 0x433   :  { %v1754_v30 = vpop.f32.mrf.mxu0  ;;  %574 = vmax.xlane.f32.xlu1 %v573_v29  ;;  %v1759_v31 = vpop.f32.mrf.mxu1 }
 0x435   :  { %v520_v32 = vpop.f32.mrf.mxu1  ;;  %v567_v33 = vpop.f32.mrf.mxu0 }
 0x436   :  { %v576_v34 = vsel %vm294_vm3, %v567_v33, -inf }
 0x437   :  { %577 = vmax.xlane.f32.xlu0 %v576_v34  ;;  %v1760_v36 = vpop.f32.mrf.mxu1  ;;  %v1765_v37 = vpop.f32.mrf.mxu0 }
 0x439   :  { %v570_v38 = vpop.f32.mrf.mxu0  ;;  %v643_v39 = vpop.f32.mrf.mxu1 }
 0x43a   :  { %v652_v40 = vpack.c.bf16 %v643_v39, %v643_v39 }
 0x43b   :  { %v1766_v41 = vpop.f32.mrf.mxu0  ;;  %v1771_v42 = vpop.f32.mrf.mxu1 }
 0x43c   :  { %v658_v43 = vsel %vm381_vm4, %v652_v40, 0 }
 0x43d   :  { %v646_v44 = vpop.f32.mrf.mxu1  ;;  %1774 = vmatpush3.bf16.msra.mxu0 %v658_v43 }
 0x43e   :  { %v653_v45 = vpack.c.bf16 %v646_v44, %v646_v44  ;;  %1785 = vmatprep.subr.bf16.mxu0 %v2034_v14 }
 0x43f   :  { %v1772_v46 = vpop.f32.mrf.mxu1 }
 0x440   :  { %v704_v47 = vsel %vm381_vm4, %v653_v45, 0 }
 0x441   :  { %1780 = vmatpush3.bf16.msra.mxu1 %v704_v47 }
 0x442   :  { %1791 = vmatprep.subr.bf16.mxu1 %v2034_v14 }
 0x444   :  { %750 = vrot.lane.b32.xlu1 %v2164_v21, %s2038_s26 }
 0x44d   :  { %800 = vrot.lane.b32.xlu0 %v2168_v24, %s2038_s26 }
 0x4bc   :  { %v575_v48 = vpop.xlane.xlu1 %574 }
 0x4bd   :  { %v579_v49 = vsub.f32 %v517_v28, %v575_v48 }
 0x4bf   :  { %v581_v50 = vmul.f32 1.442695, %v579_v49 }
 0x4c0   :  { %v578_v51 = vpop.xlane.xlu0 %577  ;;  %v751_v58 = vpop.permute.xlu1 %750 }
 0x4c1   :  { %1929 = vpow2.f32 %v581_v50  ;;  %v580_v52 = vsub.f32 %v567_v33, %v578_v51  ;;  %v756_v1 = vsel %vm198_vm2, %v751_v58, 0 }
 0x4c3   :  { %v583_v53 = vmul.f32 1.442695, %v580_v52 }
 0x4c4   :  { %v801_v3 = vpop.permute.xlu0 %800 }
 0x4c5   :  { %1931 = vpow2.f32 %v583_v53  ;;  %v806_v6 = vsel %vm198_vm2, %v801_v3, 0  ;;  %v1908_v3 = vld [vmem:[%s2408_s3 + $0x18] sm:$0xff]  }
 0x4ce   :  { %v1930_v54 = vpop.eup %1929 }
 0x4cf   :  { %v585_v55 = vsel %vm294_vm3, %v1930_v54, 0.0 }
 0x4d0   :  { %586 = vadd.xlane.f32.xlu1 %v585_v55 }
 0x4d2   :  { %v1932_v56 = vpop.eup %1931 }
 0x4d3   :  { %v588_v57 = vsel %vm294_vm3, %v1932_v56, 0.0 }
 0x4d4   :  { %589 = vadd.xlane.f32.xlu1 %v588_v57 }
 0x4e5   :  { %748 = vrot.lane.b32.xlu1 %v2164_v21, %s2039_s7 }
 0x4e9   :  { %798 = vrot.lane.b32.xlu1 %v2168_v24, %s2039_s7 }
 0x4ed   :  { %873 = vrot.lane.b32.xlu1 %v2188_v35, %s2039_s7 }
 0x559   :  { %v587_v59 = vpop.xlane.xlu1 %586 }
 0x55a   :  { %1933 = vrcp.f32 %v587_v59 }
 0x55d   :  { %v590_v60 = vpop.xlane.xlu1 %589 }
 0x55e   :  { %1935 = vrcp.f32 %v590_v60 }
 0x561   :  { %v749_v5 = vpop.permute.xlu1 %748 }
 0x565   :  { %v799_v8 = vpop.permute.xlu1 %798 }
 0x567   :  { %v1934_v61 = vpop.eup %1933 }
 0x568   :  { %v593_v62 = vmul.f32 %v1934_v61, %v1930_v54 }
 0x569   :  { %v874_v11 = vpop.permute.xlu1 %873 }
 0x56a   :  { %v650_v63 = vpack.c.bf16 %v593_v62, %v593_v62 }
 0x56b   :  { %v1936_v0 = vpop.eup %1935 }
 0x56c   :  { %1776 = vmatmul.mubr.msk.bf16.vlgmr.msra.gmra.mxu0 %vm294_vm3, %v650_v63  ;;  %v594_v2 = vmul.f32 %v1936_v0, %v1932_v56 }
 0x56d   :  { %1786 = vmatpush3.bf16.xpose.msra.mxu0 %v756_v1  ;;  %1787 = vmatprep.mubr.msk.bf16.mxu0 %vm2035_vm1, %v2034_v14 }
 0x56e   :  { %v651_v4 = vpack.c.bf16 %v594_v2, %v594_v2  ;;  %1797 = vmatprep.subr.bf16.mxu0 %v2034_v14 }
 0x570   :  { %1782 = vmatmul.mubr.msk.bf16.vlgmr.msra.gmra.mxu1 %vm294_vm3, %v651_v4 }
 0x571   :  { %1792 = vmatpush3.bf16.xpose.msra.mxu1 %v806_v6  ;;  %1793 = vmatprep.mubr.msk.bf16.mxu1 %vm2035_vm1, %v2034_v14 }
 0x572   :  { %1803 = vmatprep.subr.bf16.mxu1 %v2034_v14 }
 0x574   :  { %1788 = vmatmul.mubr.msk.bf16.vlgmr.msra.gmra.mxu0 %vm198_vm2, %v749_v5 }
 0x575   :  { %1798 = vmatpush3.bf16.msra.mxu0 %v1907_v7  ;;  %1799 = vmatprep.mubr.msk.bf16.mxu0 %vm2035_vm1, %v2034_v14 }
 0x576   :  { %1809 = vmatprep.subr.bf16.mxu0 %v2034_v14 }
 0x578   :  { %1794 = vmatmul.mubr.msk.bf16.vlgmr.msra.gmra.mxu1 %vm198_vm2, %v799_v8 }
 0x579   :  { %1805 = vmatprep.mubr.msk.bf16.mxu1 %vm2035_vm1, %v2034_v14 }
 0x57c   :  { %1800 = vmatmul.mubr.msk.bf16.vlgmr.msra.gmra.mxu0 %vm198_vm2, %v874_v11 }
 0x57d   :  { %1811 = vmatprep.mubr.msk.bf16.mxu0 %vm2035_vm1, %v2034_v14 }
 0x62c   :  { %v694_v15 = vpop.f32.mrf.mxu0 }
 0x62d   :  { %v2274_v16 = vadd.f32 %v694_v15, %v471_v13 }
 0x62e   :  { %v1777_v17 = vpop.f32.mrf.mxu0 }
 0x630   :  { %v697_v20 = vpop.f32.mrf.mxu0  ;;  %v740_v22 = vpop.f32.mrf.mxu1 }
 0x631   :  { %v2277_v25 = vadd.f32 %v740_v22, %v472_v18 }
 0x632   :  { %v1778_v26 = vpop.f32.mrf.mxu0  ;;  %v1783_v27 = vpop.f32.mrf.mxu1 }
 0x634   :  { %v743_v28 = vpop.f32.mrf.mxu1  ;;  %v792_v29 = vpop.f32.mrf.mxu0 }
 0x635   :  { %v848_v30 = vsel %vm294_vm3, %v792_v29, -inf }
 0x636   :  { %v1784_v31 = vpop.f32.mrf.mxu1  ;;  %849 = vmax.xlane.f32.xlu0 %v848_v30  ;;  %v1789_v32 = vpop.f32.mrf.mxu0 }
 0x638   :  { %v795_v19 = vpop.f32.mrf.mxu0  ;;  %v842_v33 = vpop.f32.mrf.mxu1 }
 0x639   :  { %v851_v34 = vsel %vm294_vm3, %v842_v33, -inf }
 0x63a   :  { %v1790_v36 = vpop.f32.mrf.mxu0  ;;  %852 = vmax.xlane.f32.xlu1 %v851_v34  ;;  %v1795_v23 = vpop.f32.mrf.mxu1 }
 0x63c   :  { %v845_v37 = vpop.f32.mrf.mxu1  ;;  %v918_v38 = vpop.f32.mrf.mxu0 }
 0x63d   :  { %v927_v39 = vpack.c.bf16 %v918_v38, %v918_v38 }
 0x63e   :  { %v1796_v40 = vpop.f32.mrf.mxu1  ;;  %v1801_v41 = vpop.f32.mrf.mxu0 }
 0x63f   :  { %v933_v42 = vsel %vm381_vm4, %v927_v39, 0 }
 0x640   :  { %v921_v43 = vpop.f32.mrf.mxu0  ;;  %1804 = vmatpush3.bf16.msra.mxu1 %v933_v42 }
 0x641   :  { %v928_v44 = vpack.c.bf16 %v921_v43, %v921_v43  ;;  %1815 = vmatprep.subr.bf16.mxu1 %v2034_v14 }
 0x642   :  { %v1802_v45 = vpop.f32.mrf.mxu0 }
 0x643   :  { %v979_v46 = vsel %vm381_vm4, %v928_v44, 0 }
 0x644   :  { %1810 = vmatpush3.bf16.msra.mxu0 %v979_v46 }
 0x645   :  { %1821 = vmatprep.subr.bf16.mxu0 %v2034_v14 }
 0x64b   :  { %1025 = vrot.lane.b32.xlu1 %v2164_v21, %s2040_s4 }
 0x64f   :  { %1023 = vrot.lane.b32.xlu1 %v2164_v21, %s2041_s16 }
 0x653   :  { %1073 = vrot.lane.b32.xlu1 %v2168_v24, %s2041_s16 }
 0x6bf   :  { %v850_v47 = vpop.xlane.xlu0 %849 }
 0x6c0   :  { %v854_v48 = vsub.f32 %v792_v29, %v850_v47 }
 0x6c2   :  { %v856_v49 = vmul.f32 1.442695, %v854_v48 }
 0x6c3   :  { %v853_v50 = vpop.xlane.xlu1 %852 }
 0x6c4   :  { %1937 = vpow2.f32 %v856_v49  ;;  %v855_v51 = vsub.f32 %v842_v33, %v853_v50 }
 0x6c6   :  { %v858_v52 = vmul.f32 1.442695, %v855_v51 }
 0x6c7   :  { %v1026_v60 = vpop.permute.xlu1 %1025 }
 0x6c8   :  { %1939 = vpow2.f32 %v858_v52  ;;  %v1031_v63 = vsel %vm198_vm2, %v1026_v60, 0 }
 0x6cb   :  { %v1024_v2 = vpop.permute.xlu1 %1023 }
 0x6cf   :  { %v1074_v4 = vpop.permute.xlu1 %1073 }
 0x6d1   :  { %v1938_v53 = vpop.eup %1937 }
 0x6d2   :  { %v860_v54 = vsel %vm294_vm3, %v1938_v53, 0.0 }
 0x6d3   :  { %861 = vadd.xlane.f32.xlu0 %v860_v54 }
 0x6d5   :  { %v1940_v55 = vpop.eup %1939 }
 0x6d6   :  { %v863_v56 = vsel %vm294_vm3, %v1940_v55, 0.0 }
 0x6d7   :  { %864 = vadd.xlane.f32.xlu0 %v863_v56 }
 0x6ed   :  { %1075 = vrot.lane.b32.xlu0 %v2168_v24, %s2040_s4 }
 0x6f1   :  { %1148 = vrot.lane.b32.xlu0 %v2188_v35, %s2041_s16 }
 0x75c   :  { %v862_v21 = vpop.xlane.xlu0 %861 }
 0x75d   :  { %1941 = vrcp.f32 %v862_v21 }
 0x760   :  { %v865_v57 = vpop.xlane.xlu0 %864 }
 0x761   :  { %1943 = vrcp.f32 %v865_v57 }
 0x764   :  { %v1076_v1 = vpop.permute.xlu0 %1075 }
 0x765   :  { %v1081_v35 = vsel %vm198_vm2, %v1076_v1, 0 }
 0x768   :  { %v1149_v5 = vpop.permute.xlu0 %1148 }
 0x76a   :  { %v1942_v58 = vpop.eup %1941 }
 0x76b   :  { %v868_v59 = vmul.f32 %v1942_v58, %v1938_v53 }
 0x76d   :  { %v925_v61 = vpack.c.bf16 %v868_v59, %v868_v59 }
 0x76e   :  { %v1944_v62 = vpop.eup %1943 }
 0x76f   :  { %1806 = vmatmul.mubr.msk.bf16.vlgmr.msra.gmra.mxu1 %vm294_vm3, %v925_v61  ;;  %v869_v0 = vmul.f32 %v1944_v62, %v1940_v55 }
 0x770   :  { %1816 = vmatpush3.bf16.xpose.msra.mxu1 %v1031_v63  ;;  %1817 = vmatprep.mubr.msk.bf16.mxu1 %vm2035_vm1, %v2034_v14 }
 0x771   :  { %v926_v24 = vpack.c.bf16 %v869_v0, %v869_v0  ;;  %1827 = vmatprep.subr.bf16.mxu1 %v2034_v14 }
 0x773   :  { %1812 = vmatmul.mubr.msk.bf16.vlgmr.msra.gmra.mxu0 %vm294_vm3, %v926_v24 }
 0x774   :  { %1822 = vmatpush3.bf16.xpose.msra.mxu0 %v1081_v35  ;;  %1823 = vmatprep.mubr.msk.bf16.mxu0 %vm2035_vm1, %v2034_v14 }
 0x775   :  { %1833 = vmatprep.subr.bf16.mxu0 %v2034_v14 }
 0x777   :  { %1818 = vmatmul.mubr.msk.bf16.vlgmr.msra.gmra.mxu1 %vm198_vm2, %v1024_v2 }
 0x778   :  { %1828 = vmatpush3.bf16.msra.mxu1 %v1908_v3  ;;  %1829 = vmatprep.mubr.msk.bf16.mxu1 %vm2035_vm1, %v2034_v14 }
 0x779   :  { %1839 = vmatprep.subr.bf16.mxu1 %v2034_v14 }
 0x77b   :  { %1824 = vmatmul.mubr.msk.bf16.vlgmr.msra.gmra.mxu0 %vm198_vm2, %v1074_v4 }
 0x77c   :  { %1835 = vmatprep.mubr.msk.bf16.mxu0 %vm2035_vm1, %v2034_v14 }
 0x77f   :  { %1830 = vmatmul.mubr.msk.bf16.vlgmr.msra.gmra.mxu1 %vm198_vm2, %v1149_v5 }
 0x780   :  { %1841 = vmatprep.mubr.msk.bf16.mxu1 %vm2035_vm1, %v2034_v14 }
 0x82f   :  { %v969_v6 = vpop.f32.mrf.mxu1 }
 0x830   :  { %v1021_v7 = vadd.f32 %v969_v6, %v2274_v16 }
 0x831   :  { %v1807_v8 = vpop.f32.mrf.mxu1 }
 0x833   :  { %v972_v11 = vpop.f32.mrf.mxu1  ;;  %v1015_v12 = vpop.f32.mrf.mxu0 }
 0x834   :  { %v2317_v13 = vadd.f32 %v1015_v12, %v2277_v25 }
 0x835   :  { %v1808_v15 = vpop.f32.mrf.mxu1  ;;  %v1813_v17 = vpop.f32.mrf.mxu0 }
 0x837   :  { %v1018_v18 = vpop.f32.mrf.mxu0  ;;  %v1067_v20 = vpop.f32.mrf.mxu1 }
 0x838   :  { %v1123_v22 = vsel %vm294_vm3, %v1067_v20, -inf  ;;  %v1910_v18 = vld [vmem:[#allocation5 + $0x10] sm:$0xff]  }
 0x839   :  { %1124 = vmax.xlane.f32.xlu1 %v1123_v22  ;;  %v1814_v26 = vpop.f32.mrf.mxu0  ;;  %v1819_v27 = vpop.f32.mrf.mxu1  ;;  %v1912_v22 = vld [vmem:[#allocation5] sm:$0xff]  }
 0x83a   :  { %v1913_v26 = vld [vmem:[%s2414_s9 + $0x38] sm:$0xff]   ;;  %v1914_v27 = vld [vmem:[%s2414_s9 + $0x30] sm:$0xff]  }
 0x83b   :  { %v1070_v28 = vpop.f32.mrf.mxu1  ;;  %v1117_v29 = vpop.f32.mrf.mxu0 }
 0x83c   :  { %v1126_v30 = vsel %vm294_vm3, %v1117_v29, -inf  ;;  %v1915_v28 = vld [vmem:[%s2414_s9 + $0x28] sm:$0xff]  }
 0x83d   :  { %v1820_v16 = vpop.f32.mrf.mxu1  ;;  %1127 = vmax.xlane.f32.xlu0 %v1126_v30  ;;  %v1825_v31 = vpop.f32.mrf.mxu0  ;;  %v1917_v30 = vld [vmem:[%s2414_s9 + $0x18] sm:$0xff]  }
 0x83f   :  { %v1120_v32 = vpop.f32.mrf.mxu0  ;;  %v1193_v19 = vpop.f32.mrf.mxu1 }
 0x840   :  { %v1202_v25 = vpack.c.bf16 %v1193_v19, %v1193_v19 }
 0x841   :  { %v1826_v33 = vpop.f32.mrf.mxu0  ;;  %v1831_v34 = vpop.f32.mrf.mxu1 }
 0x842   :  { %v1208_v36 = vsel %vm381_vm4, %v1202_v25, 0 }
 0x843   :  { %v1196_v23 = vpop.f32.mrf.mxu1  ;;  %1834 = vmatpush3.bf16.msra.mxu0 %v1208_v36 }
 0x844   :  { %v1203_v37 = vpack.c.bf16 %v1196_v23, %v1196_v23  ;;  %1845 = vmatprep.subr.bf16.mxu0 %v2034_v14  ;;  %v1651_v23 = vld [vmem:[%s2410_s5] ss:$0 sm:$0xff] }
 0x845   :  { %v1832_v38 = vpop.f32.mrf.mxu1 }
 0x846   :  { %v1254_v39 = vsel %vm381_vm4, %v1203_v37, 0 }
 0x847   :  { %1840 = vmatpush3.bf16.msra.mxu1 %v1254_v39 }
 0x848   :  { %1857 = vmatprep.subr.bf16.mxu1 %v2034_v14 }
 0x8c2   :  { %v1125_v40 = vpop.xlane.xlu1 %1124 }
 0x8c3   :  { %v1129_v41 = vsub.f32 %v1067_v20, %v1125_v40  ;;  %v1911_v20 = vld [vmem:[#allocation5 + $0x8] sm:$0xff]   ;;  %v1652_v40 = vld [vmem:[%s2411_s6] ss:$0 sm:$0xff] }
 0x8c5   :  { %v1131_v42 = vmul.f32 1.442695, %v1129_v41 }
 0x8c6   :  { %v1128_v43 = vpop.xlane.xlu0 %1127 }
 0x8c7   :  { %1945 = vpow2.f32 %v1131_v42  ;;  %v1130_v44 = vsub.f32 %v1117_v29, %v1128_v43  ;;  %v1916_v29 = vld [vmem:[%s2414_s9 + $0x20] sm:$0xff]  }
 0x8c9   :  { %v1133_v45 = vmul.f32 1.442695, %v1130_v44 }
 0x8cb   :  { %1947 = vpow2.f32 %v1133_v45  ;;  %v1918_v45 = vld [vmem:[%s2414_s9 + $0x10] sm:$0xff]  }
 0x8d4   :  { %v1946_v46 = vpop.eup %1945 }
 0x8d5   :  { %v1135_v47 = vsel %vm294_vm3, %v1946_v46, 0.0 }
 0x8d6   :  { %1136 = vadd.xlane.f32.xlu0 %v1135_v47  ;;  %v1920_v47 = vld [vmem:[%s2414_s9] sm:$0xff]  }
 0x8d8   :  { %v1948_v48 = vpop.eup %1947 }
 0x8d9   :  { %v1138_v49 = vsel %vm294_vm3, %v1948_v48, 0.0 }
 0x8da   :  { %1139 = vadd.xlane.f32.xlu1 %v1138_v49 }
 0x95f   :  { %v1137_v50 = vpop.xlane.xlu0 %1136 }
 0x960   :  { %1949 = vrcp.f32 %v1137_v50 }
 0x963   :  { %v1140_v51 = vpop.xlane.xlu1 %1139 }
 0x964   :  { %1951 = vrcp.f32 %v1140_v51 }
 0x96d   :  { %v1950_v52 = vpop.eup %1949 }
 0x96e   :  { %v1143_v53 = vmul.f32 %v1950_v52, %v1946_v46  ;;  %v1919_v46 = vld [vmem:[%s2414_s9 + $0x8] sm:$0xff]  }
 0x970   :  { %v1200_v54 = vpack.c.bf16 %v1143_v53, %v1143_v53 }
 0x971   :  { %v1952_v55 = vpop.eup %1951 }
 0x972   :  { %1836 = vmatmul.mubr.msk.bf16.vlgmr.msra.gmra.mxu0 %vm294_vm3, %v1200_v54  ;;  %v1144_v56 = vmul.f32 %v1952_v55, %v1948_v48  ;;  %v1653_v48 = vld [vmem:[%s2413_s8] ss:$0 sm:$0xff] }
 0x973   :  { %1853 = vmatprep.mubr.msk.bf16.mxu0 %vm2035_vm1, %v2034_v14 }
 0x974   :  { %v1201_v21 = vpack.c.bf16 %v1144_v56, %v1144_v56 }
 0x976   :  { %1842 = vmatmul.mubr.msk.bf16.vlgmr.msra.gmra.mxu1 %vm294_vm3, %v1201_v21 }
 0x977   :  { %1873 = vmatprep.mubr.msk.bf16.mxu1 %vm2035_vm1, %v2034_v14  ;;  %1858 = vmatpush3.bf16.msra.mxu1 %v1913_v26 }
 0x978   :  { %1859 = vmatprep.subr.bf16.mxu1 %v2034_v14 }
 0x97b   :  { %1860 = vmatpush3.bf16.msra.mxu1 %v1914_v27  ;;  %v1669_v27 = vld [vmem:[%s2417_s12] ss:$0 sm:$0xff] }
 0x97c   :  { %1861 = vmatprep.subr.bf16.mxu1 %v2034_v14 }
 0x97f   :  { %1862 = vmatpush3.bf16.msra.mxu1 %v1915_v28 }
 0x980   :  { %1863 = vmatprep.subr.bf16.mxu1 %v2034_v14 }
 0x983   :  { %1864 = vmatpush3.bf16.msra.mxu1 %v1916_v29 }
 0x984   :  { %1865 = vmatprep.subr.bf16.mxu1 %v2034_v14 }
 0x987   :  { %1866 = vmatpush3.bf16.msra.mxu1 %v1917_v30 }
 0x988   :  { %1867 = vmatprep.subr.bf16.mxu1 %v2034_v14 }
 0x98b   :  { %1868 = vmatpush3.bf16.msra.mxu1 %v1918_v45 }
 0x98c   :  { %1869 = vmatprep.subr.bf16.mxu1 %v2034_v14 }
 0x98f   :  { %1870 = vmatpush3.bf16.msra.mxu1 %v1919_v46 }
 0x990   :  { %1871 = vmatprep.subr.bf16.mxu1 %v2034_v14 }
 0x993   :  { %1872 = vmatpush3.bf16.msra.mxu1 %v1920_v47 }
 0xa32   :  { %v1244_v57 = vpop.f32.mrf.mxu0 }
 0xa33   :  { %v1296_v58 = vadd.f32 %v1244_v57, %v1021_v7 }
 0xa34   :  { %v1837_v59 = vpop.f32.mrf.mxu0 }
 0xa35   :  { %v1298_v60 = vadd.f32 %v1296_v58, %v2148_v9 }
 0xa36   :  { %v1247_v61 = vpop.f32.mrf.mxu0  ;;  %v1290_v62 = vpop.f32.mrf.mxu1 }
 0xa37   :  { %v1297_v63 = vadd.f32 %v1290_v62, %v2317_v13  ;;  %v1302_v0 = vsel %vm137_vm0, %v1298_v60, 0.0 }
 0xa38   :  { %v1843_v1 = vpop.f32.mrf.mxu1  ;;  %1303 = vadd.xlane.f32.xlu0 %v1302_v0  ;;  %v1838_v24 = vpop.f32.mrf.mxu0 }
 0xa39   :  { %v1299_v35 = vadd.f32 %v1297_v63, %v2150_v10  ;;  %v1909_v10 = vld [vmem:[#allocation5 + $0x18] sm:$0xff]  }
 0xa3a   :  { %v1293_v2 = vpop.f32.mrf.mxu1  ;;  %1846 = vmatpush3.bf16.msra.mxu0 %v1909_v10 }
 0xa3b   :  { %v1305_v3 = vsel %vm137_vm0, %v1299_v35, 0.0  ;;  %1847 = vmatprep.subr.bf16.mxu0 %v2034_v14 }
 0xa3c   :  { %1306 = vadd.xlane.f32.xlu1 %v1305_v3  ;;  %v1844_v4 = vpop.f32.mrf.mxu1 }
 0xa3e   :  { %1848 = vmatpush3.bf16.msra.mxu0 %v1910_v18 }
 0xa3f   :  { %1849 = vmatprep.subr.bf16.mxu0 %v2034_v14 }
 0xa42   :  { %1850 = vmatpush3.bf16.msra.mxu0 %v1911_v20 }
 0xa43   :  { %1851 = vmatprep.subr.bf16.mxu0 %v2034_v14  ;;  %v1659_v14 = vld [vmem:[%s2415_s10] ss:$0 sm:$0xff] }
 0xa46   :  { %1852 = vmatpush3.bf16.msra.mxu0 %v1912_v22  ;;  %v1668_v22 = vld [vmem:[%s2416_s11] ss:$0 sm:$0xff] }
 0xac1   :  { %v1304_v5 = vpop.xlane.xlu0 %1303 }
 0xac2   :  { %v1309_v6 = vmul.f32 0.015625, %v1304_v5 }
 0xac4   :  { %v1311_v7 = vsub.f32 %v1298_v60, %v1309_v6 }
 0xac5   :  { %v1307_v9 = vpop.xlane.xlu1 %1306 }
 0xac6   :  { %v1310_v8 = vmul.f32 0.015625, %v1307_v9  ;;  %v1313_v11 = vmul.f32 %v1311_v7, %v1311_v7 }
 0xac8   :  { %v1312_v12 = vsub.f32 %v1299_v35, %v1310_v8  ;;  %v1315_v13 = vsel %vm137_vm0, %v1313_v11, 0.0 }
 0xac9   :  { %1316 = vadd.xlane.f32.xlu0 %v1315_v13 }
 0xaca   :  { %v1314_v15 = vmul.f32 %v1312_v12, %v1312_v12 }
 0xacc   :  { %v1318_v17 = vsel %vm137_vm0, %v1314_v15, 0.0 }
 0xacd   :  { %1319 = vadd.xlane.f32.xlu1 %v1318_v17 }
 0xb52   :  { %v1317_v16 = vpop.xlane.xlu0 %1316 }
 0xb53   :  { %v1321_v31 = vmul.f32 0.015625, %v1317_v16 }
 0xb55   :  { %v1323_v32 = vadd.f32 1e-05, %v1321_v31 }
 0xb56   :  { %v1320_v19 = vpop.xlane.xlu1 %1319 }
 0xb57   :  { %1953 = vrsqrt.f32 %v1323_v32  ;;  %v1322_v25 = vmul.f32 0.015625, %v1320_v19 }
 0xb59   :  { %v1324_v33 = vadd.f32 1e-05, %v1322_v25 }
 0xb5b   :  { %1955 = vrsqrt.f32 %v1324_v33 }
 0xb64   :  { %v1954_v34 = vpop.eup %1953 }
 0xb65   :  { %v1327_v36 = vmul.f32 %v1954_v34, %v1311_v7 }
 0xb67   :  { %v1335_v39 = vmul.f32 %v1651_v23, %v1327_v36 }
 0xb68   :  { %v1956_v37 = vpop.eup %1955 }
 0xb69   :  { %v1328_v38 = vmul.f32 %v1956_v37, %v1312_v12  ;;  %v1343_v42 = vadd.f32 %v1652_v40, %v1335_v39 }
 0xb6b   :  { %v1336_v41 = vmul.f32 %v1651_v23, %v1328_v38 }
 0xb6d   :  { %v1344_v43 = vadd.f32 %v1652_v40, %v1336_v41 }
 0xb6f   :  { %v1345_v44 = vpack.c.bf16 %v1344_v43, %v1343_v42 }
 0xb71   :  { %1854 = vmatmul.mubr.msk.bf16.vlgmr.msra.gmra.mxu0 %vm137_vm0, %v1345_v44 }
 0xc31   :  { %v1422_v49 = vpop.f32.mrf.mxu0 }
 0xc32   :  { %v1423_v51 = vadd.f32 %v1653_v48, %v1422_v49 }
 0xc33   :  { %v1855_v50 = vpop.f32.mrf.mxu0 }
 0xc34   :  { %v1429_v55 = vmax.f32 %v1423_v51, 0.0 }
 0xc35   :  { %v1425_v52 = vpop.f32.mrf.mxu0 }
 0xc36   :  { %v1426_v53 = vadd.f32 %v1653_v48, %v1425_v52 }
 0xc37   :  { %v1856_v54 = vpop.f32.mrf.mxu0 }
 0xc38   :  { %v1430_v56 = vmax.f32 %v1426_v53, 0.0 }
 0xc3a   :  { %v1431_v21 = vpack.c.bf16 %v1430_v56, %v1429_v55 }
 0xc3c   :  { %1874 = vmatmul.mubr.bf16.vlgmr.msra.gmra.mxu1 %v1431_v21 }
 0xcfc   :  { %v1537_v57 = vpop.f32.mrf.mxu1 }
 0xcfd   :  { %v1538_v58 = vadd.f32 %v1659_v14, %v1537_v57 }
 0xcfe   :  { %v1875_v59 = vpop.f32.mrf.mxu1 }
 0xcff   :  { %v1544_v60 = vadd.f32 %v1538_v58, %v1343_v42 }
 0xd00   :  { %v1540_v61 = vpop.f32.mrf.mxu1 }
 0xd01   :  { %v1541_v62 = vadd.f32 %v1659_v14, %v1540_v61  ;;  %v1548_v63 = vsel %vm137_vm0, %v1544_v60, 0.0 }
 0xd02   :  { %1549 = vadd.xlane.f32.xlu0 %v1548_v63  ;;  %v1876_v0 = vpop.f32.mrf.mxu1 }
 0xd03   :  { %v1545_v1 = vadd.f32 %v1541_v62, %v1344_v43 }
 0xd05   :  { %v1551_v24 = vsel %vm137_vm0, %v1545_v1, 0.0 }
 0xd06   :  { %1552 = vadd.xlane.f32.xlu1 %v1551_v24 }
 0xd8b   :  { %v1550_v35 = vpop.xlane.xlu0 %1549 }
 0xd8c   :  { %v1554_v2 = vmul.f32 0.015625, %v1550_v35 }
 0xd8e   :  { %v1556_v3 = vsub.f32 %v1544_v60, %v1554_v2 }
 0xd8f   :  { %v1553_v4 = vpop.xlane.xlu1 %1552 }
 0xd90   :  { %v1555_v5 = vmul.f32 0.015625, %v1553_v4  ;;  %v1558_v6 = vmul.f32 %v1556_v3, %v1556_v3 }
 0xd92   :  { %v1557_v7 = vsub.f32 %v1545_v1, %v1555_v5  ;;  %v1560_v9 = vsel %vm137_vm0, %v1558_v6, 0.0 }
 0xd93   :  { %1561 = vadd.xlane.f32.xlu0 %v1560_v9 }
 0xd94   :  { %v1559_v8 = vmul.f32 %v1557_v7, %v1557_v7 }
 0xd96   :  { %v1563_v11 = vsel %vm137_vm0, %v1559_v8, 0.0 }
 0xd97   :  { %1564 = vadd.xlane.f32.xlu1 %v1563_v11 }
 0xe1c   :  { %v1562_v12 = vpop.xlane.xlu0 %1561 }
 0xe1d   :  { %v1566_v13 = vmul.f32 0.015625, %v1562_v12 }
 0xe1f   :  { %v1568_v15 = vadd.f32 1e-05, %v1566_v13 }
 0xe20   :  { %v1565_v17 = vpop.xlane.xlu1 %1564 }
 0xe21   :  { %1957 = vrsqrt.f32 %v1568_v15  ;;  %v1567_v10 = vmul.f32 0.015625, %v1565_v17 }
 0xe23   :  { %v1569_v18 = vadd.f32 1e-05, %v1567_v10 }
 0xe25   :  { %1959 = vrsqrt.f32 %v1569_v18 }
 0xe2e   :  { %v1958_v20 = vpop.eup %1957 }
 0xe2f   :  { %v1572_v26 = vmul.f32 %v1958_v20, %v1556_v3 }
 0xe31   :  { %v1580_v28 = vmul.f32 %v1668_v22, %v1572_v26 }
 0xe32   :  { %v1960_v29 = vpop.eup %1959 }
 0xe33   :  { %v1573_v30 = vmul.f32 %v1960_v29, %v1557_v7  ;;  %v1588_v16 = vadd.f32 %v1669_v27, %v1580_v28 }
 0xe35   :  { %v1581_v31 = vmul.f32 %v1668_v22, %v1573_v30  ;;  %1590 = vst.msk [vmem:[#allocation7] sm:$0xff] %vm137_vm0, %v1588_v16 }
 0xe37   :  { %v1589_v32 = vadd.f32 %v1669_v27, %v1581_v31 }
 0xe39   :  { %1591 = vst.msk [vmem:[#allocation7 + $0x8] sm:$0xff] %vm137_vm0, %v1589_v32 }
 0xe3a   :  { %2012 = shalt.err (!%p2009_p0)
}
 0xe3b   :  { %1603 = dma.vmem_to_hbm [thread:$0]  %s1598_s1, 256, %s2418_s13, [#allocation4], %s2028_s28, %s2028_s28, %s2029_s29  }
 0xe3c   :  { %2025 = dma.done.wait [#allocation4], 256  }
 0xe3d   :  { %2026 = vsyncadd [#allocation4], 4294967040 }
 0xe3e   :  { %1607 = vsyncpa [#allocation3], 1 }
 0xe3f   :  { %1608 = vsyncpa [#allocation6], 1 }
 0xe40   :  { %1609 = vsyncpa [#allocation4], 1 }

</bundles_post_ra>
